<compile_context>
chip_gen: v5e
topology: v5e:2x2
jax: 0.10.0
libtpu: 0.0.40
codegen_flags: <defaults>
</compile_context>

<pallas_src>
import math
import numpy as np
import jax
import jax.numpy as jnp
from jax.experimental import pallas as pl
from jax.experimental.pallas import tpu as pltpu

# ---------------- model config (small, deterministic) ----------------
B = 2            # batch
T = 32           # seq len (== config.block_size)
C = 32           # n_embd
N_HEAD = 4       # n_embd % n_head == 0 (heads are NOT split in this forward)
WINDOW = 16      # window_size  (<= block_size)
STRIDE = 8       # stride
# TODO(synk): reference forward uses undefined `self.scale`; we use 1/sqrt(C)
# since q/k keep the full embedding dim (no head split) in this forward.
SCALE = 1.0 / math.sqrt(C)

assert C % N_HEAD == 0
assert WINDOW <= T
# Coverage is constant within each STRIDE-row block under these conditions,
# which lets 1/coverage be a trace-time Python constant (no extra input/DMA).
# TODO(synk): general T/WINDOW/STRIDE would need a per-row coverage vector.
assert T % STRIDE == 0 and WINDOW % STRIDE == 0


# ---------------- BitNet-style fake quantization (host / reference side) ----------------
def act_quant(x):
    """BitActivationQuant: per-token 8-bit absmax fake quant over last axis."""
    s = 127.0 / jnp.maximum(jnp.max(jnp.abs(x), axis=-1, keepdims=True), 1e-5)
    return jnp.clip(jnp.round(x * s), -128.0, 127.0) / s


def weight_quant_parts(w):
    """BitLinear b1.58 ternary weight quant, returned as (ternary, scale)."""
    s = jnp.maximum(jnp.mean(jnp.abs(w)), 1e-5)
    return jnp.clip(jnp.round(w / s), -1.0, 1.0), s


# ---------------- kernel-side helpers ----------------
def _fast_recip(x):
    """EUP approx reciprocal + one Newton step: ~f32 accurate, no VPU divide."""
    r = pl.reciprocal(x, approx=True)
    return r * (2.0 - x * r)


def _quant_int(x):
    """act_quant split into (integer part in [-128,127], per-row dequant scale)."""
    amax = jnp.maximum(jnp.max(jnp.abs(x), axis=-1, keepdims=True), 1e-5)
    xi = jnp.clip(jnp.round(x * (127.0 * _fast_recip(amax))), -128.0, 127.0)
    return xi, amax * (1.0 / 127.0)


def _quant_deq(x):
    xi, deq = _quant_int(x)
    return xi * deq


# ---------------- Pallas kernel ----------------
def _make_swa_kernel(wp_scale):
    """wp_scale: Python float (BitLinear weight scale of the output projection)."""
    windows = [(s, min(s + WINDOW, T)) for s in range(0, T, STRIDE)]

    def kernel(x_ref, wqkv_ref, colscale_ref, wp_ref, out_ref):
        # One grid step == one batch element; all refs are 2-D (lane-friendly).
        # ---- hoisted: activation quant + fused Q|K|V projection (once) ----
        x_i, x_deq = _quant_int(x_ref[...])                   # (T,C) ints, (T,1)
        # Integer activations x ternary weights are exact in bf16 -> bf16 MXU
        # operands, f32 accumulate; scales applied after the matmul.
        qkv = jnp.dot(x_i.astype(jnp.bfloat16), wqkv_ref[...],
                      preferred_element_type=jnp.float32)      # (T, 3C)
        qkv = qkv * x_deq * colscale_ref[...]

        # Q: keep the integer part + per-token dequant scale (no dequant needed).
        q_i, q_deq = _quant_int(qkv[:, :C])                    # (T,C), (T,1)
        # K: hoisted transpose BEFORE quantization -> dequant scale is already
        # a (1,T) row vector and the score matmul needs no per-window transposes.
        k_rawT = jnp.transpose(qkv[:, C:2 * C])                # (C,T), once
        k_amax = jnp.maximum(jnp.max(jnp.abs(k_rawT), axis=0, keepdims=True),
                             1e-5)                             # (1,T)
        k_iT = jnp.clip(jnp.round(k_rawT * (127.0 * _fast_recip(k_amax))),
                        -128.0, 127.0)
        k_deq = k_amax * (1.0 / 127.0)                         # (1,T)
        # V: dequantized f32 (att @ v stays f32: softmax probs are not exact in
        # bf16, so keep bit-level agreement with the reference).
        v = _quant_deq(qkv[:, 2 * C:])                         # (T,C)

        # ---- hoisted scores: ONE integer-bf16 MXU matmul for all T x T ----
        s_full = jnp.dot(q_i.astype(jnp.bfloat16), k_iT.astype(jnp.bfloat16),
                         preferred_element_type=jnp.float32)   # exact int sums
        s_full = s_full * (q_deq * SCALE) * k_deq              # (T,T)

        wp = wp_ref[...]                                       # (C,C) ternary bf16

        # ---- per-window softmax + att@v + out-projection (static unroll) ----
        ys = []
        for (s, e) in windows:
            sc = s_full[s:e, s:e]                              # static slice
            m = jnp.max(sc, axis=-1, keepdims=True)
            p = jnp.exp(sc - m)
            att = p * _fast_recip(jnp.sum(p, axis=-1, keepdims=True))
            # attn_dropout / proj_dropout are identity at inference (dropout=0).
            win = jnp.dot(att, v[s:e], preferred_element_type=jnp.float32)
            w_i, w_deq = _quant_int(win)      # BitLinear input quant of out-proj
            y = jnp.dot(w_i.astype(jnp.bfloat16), wp,
                        preferred_element_type=jnp.float32)    # int x ternary
            ys.append(y * (w_deq * wp_scale))                  # scales after

        # ---- overlap-add + coverage normalization, per STRIDE-row block ----
        # Register accumulation: window outputs stay in vregs; each 8-row output
        # block is stored exactly once (no VMEM scratch read-modify-write).
        for blk in range(T // STRIDE):
            r0, r1 = blk * STRIDE, (blk + 1) * STRIDE
            parts = [ys[w][r0 - s:r1 - s]
                     for w, (s, e) in enumerate(windows) if s <= r0 and r1 <= e]
            block = parts[0]
            for extra in parts[1:]:
                block = block + extra
            inv_cov = 1.0 / float(max(len(parts), 1))          # trace-time const
            out_ref[pl.ds(r0, STRIDE), :] = block * inv_cov

    return kernel


def sliding_window_attention(x, wqkv_tern, col_scale, wp_tern, wp_scale):
    """x: (B,T,C) f32; wqkv_tern: (C,3C) bf16 ternary fused QKV weight;
    col_scale: (1,3C) f32 per-output-column weight scales; wp_tern: (C,C) bf16
    ternary out-proj weight; wp_scale: Python float out-proj weight scale."""
    kernel = _make_swa_kernel(float(wp_scale))
    return pl.pallas_call(
        kernel,
        out_shape=jax.ShapeDtypeStruct((B, T, C), jnp.float32),
        grid_spec=pltpu.PrefetchScalarGridSpec(
            num_scalar_prefetch=0,
            grid=(B,),
            in_specs=[
                pl.BlockSpec((None, T, C), lambda b: (b, 0, 0)),  # x (one batch)
                pl.BlockSpec((C, 3 * C), lambda b: (0, 0)),       # fused QKV tern
                pl.BlockSpec((1, 3 * C), lambda b: (0, 0)),       # weight scales
                pl.BlockSpec((C, C), lambda b: (0, 0)),           # out-proj tern
            ],
            out_specs=pl.BlockSpec((None, T, C), lambda b: (b, 0, 0)),
        ),
        # "parallel" over batch -> both TensorCores on v7x; on 1-TC v5e/v6e it
        # is a short serial loop (fold B into rows only if B > core count).
        # Explicit VMEM limit: re-derive tiling before scaling T/C on v7x
        # (64 MiB physical VMEM vs 128 MiB on v5e/v6e).
        compiler_params=pltpu.CompilerParams(
            dimension_semantics=("parallel",),
            vmem_limit_bytes=32 * 1024 * 1024,
        ),
    )(x, wqkv_tern, col_scale, wp_tern)


# ---------------- pure-JAX reference (original per-window semantics) ----------------
def reference(x, wq, wk, wv, wp):
    out = jnp.zeros((B, T, C), jnp.float32)
    coverage = np.zeros((T,), np.float32)
    for s in range(0, T, STRIDE):
        e = min(s + WINDOW, T)
        xw = x[:, s:e, :]
        xq = act_quant(xw)
        q = act_quant(xq @ wq)
        k = act_quant(xq @ wk)
        v = act_quant(xq @ wv)
        sc = jnp.einsum("bqc,bkc->bqk", q, k) * SCALE
        att = jax.nn.softmax(sc, axis=-1)
        y = act_quant(jnp.einsum("bqk,bkc->bqc", att, v)) @ wp
        out = out.at[:, s:e, :].add(y)
        coverage[s:e] += 1.0
    coverage = np.maximum(coverage, 1.0)
    return out / jnp.asarray(coverage)[None, :, None]


if __name__ == "__main__":
    key = jax.random.PRNGKey(0)
    k_x, k_q, k_k, k_v, k_p = jax.random.split(key, 5)

    x = jax.random.normal(k_x, (B, T, C), dtype=jnp.float32)

    # PyTorch-style (out, in) weights, GPT-ish init, BitNet ternary quantized.
    def make_w(k):
        w = 0.02 * jax.random.normal(k, (C, C), dtype=jnp.float32)
        return weight_quant_parts(w)

    (tq, sq), (tk, sk), (tv, sv), (tp, sp) = (make_w(k_q), make_w(k_k),
                                              make_w(k_v), make_w(k_p))

    # Kernel-side packing: fused ternary QKV weight in bf16 (exact: -1/0/+1),
    # transposed to (in, out); per-output-column f32 scale vector; ternary
    # bf16 out-projection weight with its scalar f32 scale passed separately.
    wqkv_tern = jnp.concatenate([tq.T, tk.T, tv.T], axis=1).astype(jnp.bfloat16)
    col_scale = jnp.concatenate(
        [jnp.full((C,), sq, jnp.float32),
         jnp.full((C,), sk, jnp.float32),
         jnp.full((C,), sv, jnp.float32)]).reshape(1, 3 * C)
    wp_tern = tp.T.astype(jnp.bfloat16)

    out = sliding_window_attention(x, wqkv_tern, col_scale, wp_tern, float(sp))
    out = jax.block_until_ready(out)

    wq_full = (tq * sq).T
    wk_full = (tk * sk).T
    wv_full = (tv * sv).T
    wp_full = (tp * sp).T
    ref = jax.block_until_ready(reference(x, wq_full, wk_full, wv_full, wp_full))
    np.testing.assert_allclose(np.asarray(out), np.asarray(ref), rtol=1e-2, atol=1e-3)

    print("KERNEL_OK")
</pallas_src>

<mosaic_0001>
module attributes {stable_mosaic.version = 11 : i64} {
  func.func @kernel(%arg0: i32, %arg1: memref<1x32x32xf32, #tpu.memory_space<vmem>>, %arg2: memref<32x96xbf16, #tpu.memory_space<vmem>>, %arg3: memref<1x96xf32, #tpu.memory_space<vmem>>, %arg4: memref<32x32xbf16, #tpu.memory_space<vmem>>, %arg5: memref<1x32x32xf32, #tpu.memory_space<vmem>>) attributes {dimension_semantics = [#tpu.dimension_semantics<parallel>], iteration_bounds = array<i64: 2>, scalar_prefetch = 0 : i64, scratch_operands = 0 : i64, tpu.core_type = #tpu.core_type<tc>, window_params = [{transform_indices = @transform_0, window_bounds = array<i64: 1, 32, 32>}, {pipeline_mode = #tpu.pipeline_mode<synchronous>, transform_indices = @transform_1, window_bounds = array<i64: 32, 96>}, {pipeline_mode = #tpu.pipeline_mode<synchronous>, transform_indices = @transform_2, window_bounds = array<i64: 1, 96>}, {pipeline_mode = #tpu.pipeline_mode<synchronous>, transform_indices = @transform_3, window_bounds = array<i64: 32, 32>}, {transform_indices = @transform_4, window_bounds = array<i64: 1, 32, 32>}]} {
    %c0 = arith.constant 0 : index
    %c0_0 = arith.constant 0 : index
    %c0_1 = arith.constant 0 : index
    %0 = vector.load %arg1[%c0, %c0_0, %c0_1] : memref<1x32x32xf32, #tpu.memory_space<vmem>>, vector<1x32x32xf32>
    %1 = vector.shape_cast %0 : vector<1x32x32xf32> to vector<32x32xf32>
    %2 = math.absf %1 : vector<32x32xf32>
    %cst = arith.constant dense<0xFF800000> : vector<32xf32>
    %3 = vector.multi_reduction <maximumf>, %2, %cst [1] : vector<32x32xf32> to vector<32xf32>
    %4 = vector.shape_cast %3 : vector<32xf32> to vector<32x1xf32>
    %cst_2 = arith.constant 9.99999974E-6 : f32
    %5 = vector.broadcast %cst_2 : f32 to vector<32x1xf32>
    %6 = arith.maximumf %4, %5 : vector<32x1xf32>
    %7 = tpu.reciprocal %6 {approx = true} : vector<32x1xf32> -> vector<32x1xf32>
    %8 = arith.mulf %6, %7 : vector<32x1xf32>
    %cst_3 = arith.constant 2.000000e+00 : f32
    %9 = vector.broadcast %cst_3 : f32 to vector<32x1xf32>
    %10 = arith.subf %9, %8 : vector<32x1xf32>
    %11 = arith.mulf %7, %10 : vector<32x1xf32>
    %cst_4 = arith.constant 1.270000e+02 : f32
    %12 = vector.broadcast %cst_4 : f32 to vector<32x1xf32>
    %13 = arith.mulf %12, %11 : vector<32x1xf32>
    %14 = vector.broadcast %13 : vector<32x1xf32> to vector<32x32xf32>
    %15 = arith.mulf %1, %14 : vector<32x32xf32>
    %16 = math.roundeven %15 : vector<32x32xf32>
    %cst_5 = arith.constant -1.280000e+02 : f32
    %cst_6 = arith.constant 1.270000e+02 : f32
    %17 = vector.broadcast %cst_5 : f32 to vector<32x32xf32>
    %18 = arith.maximumf %17, %16 : vector<32x32xf32>
    %19 = vector.broadcast %cst_6 : f32 to vector<32x32xf32>
    %20 = arith.minimumf %19, %18 : vector<32x32xf32>
    %cst_7 = arith.constant 0.00787401571 : f32
    %21 = vector.broadcast %cst_7 : f32 to vector<32x1xf32>
    %22 = arith.mulf %6, %21 : vector<32x1xf32>
    %23 = arith.truncf %20 : vector<32x32xf32> to vector<32x32xbf16>
    %c0_8 = arith.constant 0 : index
    %c0_9 = arith.constant 0 : index
    %24 = vector.load %arg2[%c0_8, %c0_9] : memref<32x96xbf16, #tpu.memory_space<vmem>>, vector<32x96xbf16>
    %cst_10 = arith.constant dense<0.000000e+00> : vector<32x96xf32>
    %25 = tpu.matmul %23, %24, %cst_10 {dimension_numbers = #tpu.dot_dimension_numbers<[1], [0], [0], [1], [0, 0, 1, 1], [], []>} : vector<32x32xbf16>, vector<32x96xbf16>, vector<32x96xf32> -> vector<32x96xf32>
    %26 = vector.broadcast %22 : vector<32x1xf32> to vector<32x96xf32>
    %27 = arith.mulf %25, %26 : vector<32x96xf32>
    %c0_11 = arith.constant 0 : index
    %c0_12 = arith.constant 0 : index
    %28 = vector.load %arg3[%c0_11, %c0_12] : memref<1x96xf32, #tpu.memory_space<vmem>>, vector<1x96xf32>
    %29 = vector.broadcast %28 : vector<1x96xf32> to vector<32x96xf32>
    %30 = arith.mulf %27, %29 : vector<32x96xf32>
    %31 = vector.extract_strided_slice %30 {offsets = [0, 0], sizes = [32, 32], strides = [1, 1]} : vector<32x96xf32> to vector<32x32xf32>
    %32 = math.absf %31 : vector<32x32xf32>
    %cst_13 = arith.constant dense<0xFF800000> : vector<32xf32>
    %33 = vector.multi_reduction <maximumf>, %32, %cst_13 [1] : vector<32x32xf32> to vector<32xf32>
    %34 = vector.shape_cast %33 : vector<32xf32> to vector<32x1xf32>
    %cst_14 = arith.constant 9.99999974E-6 : f32
    %35 = vector.broadcast %cst_14 : f32 to vector<32x1xf32>
    %36 = arith.maximumf %34, %35 : vector<32x1xf32>
    %37 = tpu.reciprocal %36 {approx = true} : vector<32x1xf32> -> vector<32x1xf32>
    %38 = arith.mulf %36, %37 : vector<32x1xf32>
    %cst_15 = arith.constant 2.000000e+00 : f32
    %39 = vector.broadcast %cst_15 : f32 to vector<32x1xf32>
    %40 = arith.subf %39, %38 : vector<32x1xf32>
    %41 = arith.mulf %37, %40 : vector<32x1xf32>
    %cst_16 = arith.constant 1.270000e+02 : f32
    %42 = vector.broadcast %cst_16 : f32 to vector<32x1xf32>
    %43 = arith.mulf %42, %41 : vector<32x1xf32>
    %44 = vector.broadcast %43 : vector<32x1xf32> to vector<32x32xf32>
    %45 = arith.mulf %31, %44 : vector<32x32xf32>
    %46 = math.roundeven %45 : vector<32x32xf32>
    %cst_17 = arith.constant -1.280000e+02 : f32
    %cst_18 = arith.constant 1.270000e+02 : f32
    %47 = vector.broadcast %cst_17 : f32 to vector<32x32xf32>
    %48 = arith.maximumf %47, %46 : vector<32x32xf32>
    %49 = vector.broadcast %cst_18 : f32 to vector<32x32xf32>
    %50 = arith.minimumf %49, %48 : vector<32x32xf32>
    %cst_19 = arith.constant 0.00787401571 : f32
    %51 = vector.broadcast %cst_19 : f32 to vector<32x1xf32>
    %52 = arith.mulf %36, %51 : vector<32x1xf32>
    %53 = vector.extract_strided_slice %30 {offsets = [0, 32], sizes = [32, 32], strides = [1, 1]} : vector<32x96xf32> to vector<32x32xf32>
    %54 = tpu.transpose %53, [1, 0] : vector<32x32xf32> -> vector<32x32xf32>
    %55 = math.absf %54 : vector<32x32xf32>
    %cst_20 = arith.constant dense<0xFF800000> : vector<32xf32>
    %56 = vector.multi_reduction <maximumf>, %55, %cst_20 [0] : vector<32x32xf32> to vector<32xf32>
    %57 = vector.shape_cast %56 : vector<32xf32> to vector<1x32xf32>
    %cst_21 = arith.constant 9.99999974E-6 : f32
    %58 = vector.broadcast %cst_21 : f32 to vector<1x32xf32>
    %59 = arith.maximumf %57, %58 : vector<1x32xf32>
    %60 = tpu.reciprocal %59 {approx = true} : vector<1x32xf32> -> vector<1x32xf32>
    %61 = arith.mulf %59, %60 : vector<1x32xf32>
    %cst_22 = arith.constant 2.000000e+00 : f32
    %62 = vector.broadcast %cst_22 : f32 to vector<1x32xf32>
    %63 = arith.subf %62, %61 : vector<1x32xf32>
    %64 = arith.mulf %60, %63 : vector<1x32xf32>
    %cst_23 = arith.constant 1.270000e+02 : f32
    %65 = vector.broadcast %cst_23 : f32 to vector<1x32xf32>
    %66 = arith.mulf %65, %64 : vector<1x32xf32>
    %67 = vector.broadcast %66 : vector<1x32xf32> to vector<32x32xf32>
    %68 = arith.mulf %54, %67 : vector<32x32xf32>
    %69 = math.roundeven %68 : vector<32x32xf32>
    %cst_24 = arith.constant -1.280000e+02 : f32
    %cst_25 = arith.constant 1.270000e+02 : f32
    %70 = vector.broadcast %cst_24 : f32 to vector<32x32xf32>
    %71 = arith.maximumf %70, %69 : vector<32x32xf32>
    %72 = vector.broadcast %cst_25 : f32 to vector<32x32xf32>
    %73 = arith.minimumf %72, %71 : vector<32x32xf32>
    %cst_26 = arith.constant 0.00787401571 : f32
    %74 = vector.broadcast %cst_26 : f32 to vector<1x32xf32>
    %75 = arith.mulf %59, %74 : vector<1x32xf32>
    %76 = vector.extract_strided_slice %30 {offsets = [0, 64], sizes = [32, 32], strides = [1, 1]} : vector<32x96xf32> to vector<32x32xf32>
    %77 = math.absf %76 : vector<32x32xf32>
    %cst_27 = arith.constant dense<0xFF800000> : vector<32xf32>
    %78 = vector.multi_reduction <maximumf>, %77, %cst_27 [1] : vector<32x32xf32> to vector<32xf32>
    %79 = vector.shape_cast %78 : vector<32xf32> to vector<32x1xf32>
    %cst_28 = arith.constant 9.99999974E-6 : f32
    %80 = vector.broadcast %cst_28 : f32 to vector<32x1xf32>
    %81 = arith.maximumf %79, %80 : vector<32x1xf32>
    %82 = tpu.reciprocal %81 {approx = true} : vector<32x1xf32> -> vector<32x1xf32>
    %83 = arith.mulf %81, %82 : vector<32x1xf32>
    %cst_29 = arith.constant 2.000000e+00 : f32
    %84 = vector.broadcast %cst_29 : f32 to vector<32x1xf32>
    %85 = arith.subf %84, %83 : vector<32x1xf32>
    %86 = arith.mulf %82, %85 : vector<32x1xf32>
    %cst_30 = arith.constant 1.270000e+02 : f32
    %87 = vector.broadcast %cst_30 : f32 to vector<32x1xf32>
    %88 = arith.mulf %87, %86 : vector<32x1xf32>
    %89 = vector.broadcast %88 : vector<32x1xf32> to vector<32x32xf32>
    %90 = arith.mulf %76, %89 : vector<32x32xf32>
    %91 = math.roundeven %90 : vector<32x32xf32>
    %cst_31 = arith.constant -1.280000e+02 : f32
    %cst_32 = arith.constant 1.270000e+02 : f32
    %92 = vector.broadcast %cst_31 : f32 to vector<32x32xf32>
    %93 = arith.maximumf %92, %91 : vector<32x32xf32>
    %94 = vector.broadcast %cst_32 : f32 to vector<32x32xf32>
    %95 = arith.minimumf %94, %93 : vector<32x32xf32>
    %cst_33 = arith.constant 0.00787401571 : f32
    %96 = vector.broadcast %cst_33 : f32 to vector<32x1xf32>
    %97 = arith.mulf %81, %96 : vector<32x1xf32>
    %98 = vector.broadcast %97 : vector<32x1xf32> to vector<32x32xf32>
    %99 = arith.mulf %95, %98 : vector<32x32xf32>
    %100 = arith.truncf %50 : vector<32x32xf32> to vector<32x32xbf16>
    %101 = arith.truncf %73 : vector<32x32xf32> to vector<32x32xbf16>
    %cst_34 = arith.constant dense<0.000000e+00> : vector<32x32xf32>
    %102 = tpu.matmul %100, %101, %cst_34 {dimension_numbers = #tpu.dot_dimension_numbers<[1], [0], [0], [1], [0, 0, 1, 1], [], []>} : vector<32x32xbf16>, vector<32x32xbf16>, vector<32x32xf32> -> vector<32x32xf32>
    %cst_35 = arith.constant 0.176776692 : f32
    %103 = vector.broadcast %cst_35 : f32 to vector<32x1xf32>
    %104 = arith.mulf %52, %103 : vector<32x1xf32>
    %105 = vector.broadcast %104 : vector<32x1xf32> to vector<32x32xf32>
    %106 = arith.mulf %102, %105 : vector<32x32xf32>
    %107 = vector.broadcast %75 : vector<1x32xf32> to vector<32x32xf32>
    %108 = arith.mulf %106, %107 : vector<32x32xf32>
    %c0_36 = arith.constant 0 : index
    %c0_37 = arith.constant 0 : index
    %109 = vector.load %arg4[%c0_36, %c0_37] : memref<32x32xbf16, #tpu.memory_space<vmem>>, vector<32x32xbf16>
    %110 = vector.extract_strided_slice %108 {offsets = [0, 0], sizes = [16, 16], strides = [1, 1]} : vector<32x32xf32> to vector<16x16xf32>
    %cst_38 = arith.constant dense<0xFF800000> : vector<16xf32>
    %111 = vector.multi_reduction <maximumf>, %110, %cst_38 [1] : vector<16x16xf32> to vector<16xf32>
    %112 = vector.shape_cast %111 : vector<16xf32> to vector<16x1xf32>
    %113 = vector.broadcast %112 : vector<16x1xf32> to vector<16x16xf32>
    %114 = arith.subf %110, %113 : vector<16x16xf32>
    %115 = math.exp %114 : vector<16x16xf32>
    %cst_39 = arith.constant dense<0.000000e+00> : vector<16xf32>
    %116 = vector.multi_reduction <add>, %115, %cst_39 [1] : vector<16x16xf32> to vector<16xf32>
    %117 = vector.shape_cast %116 : vector<16xf32> to vector<16x1xf32>
    %118 = tpu.reciprocal %117 {approx = true} : vector<16x1xf32> -> vector<16x1xf32>
    %119 = arith.mulf %117, %118 : vector<16x1xf32>
    %cst_40 = arith.constant 2.000000e+00 : f32
    %120 = vector.broadcast %cst_40 : f32 to vector<16x1xf32>
    %121 = arith.subf %120, %119 : vector<16x1xf32>
    %122 = arith.mulf %118, %121 : vector<16x1xf32>
    %123 = vector.broadcast %122 : vector<16x1xf32> to vector<16x16xf32>
    %124 = arith.mulf %115, %123 : vector<16x16xf32>
    %125 = vector.extract_strided_slice %99 {offsets = [0, 0], sizes = [16, 32], strides = [1, 1]} : vector<32x32xf32> to vector<16x32xf32>
    %cst_41 = arith.constant dense<0.000000e+00> : vector<16x32xf32>
    %126 = tpu.matmul %124, %125, %cst_41 {dimension_numbers = #tpu.dot_dimension_numbers<[1], [0], [0], [1], [0, 0, 1, 1], [], []>} : vector<16x16xf32>, vector<16x32xf32>, vector<16x32xf32> -> vector<16x32xf32>
    %127 = math.absf %126 : vector<16x32xf32>
    %cst_42 = arith.constant dense<0xFF800000> : vector<16xf32>
    %128 = vector.multi_reduction <maximumf>, %127, %cst_42 [1] : vector<16x32xf32> to vector<16xf32>
    %129 = vector.shape_cast %128 : vector<16xf32> to vector<16x1xf32>
    %cst_43 = arith.constant 9.99999974E-6 : f32
    %130 = vector.broadcast %cst_43 : f32 to vector<16x1xf32>
    %131 = arith.maximumf %129, %130 : vector<16x1xf32>
    %132 = tpu.reciprocal %131 {approx = true} : vector<16x1xf32> -> vector<16x1xf32>
    %133 = arith.mulf %131, %132 : vector<16x1xf32>
    %cst_44 = arith.constant 2.000000e+00 : f32
    %134 = vector.broadcast %cst_44 : f32 to vector<16x1xf32>
    %135 = arith.subf %134, %133 : vector<16x1xf32>
    %136 = arith.mulf %132, %135 : vector<16x1xf32>
    %cst_45 = arith.constant 1.270000e+02 : f32
    %137 = vector.broadcast %cst_45 : f32 to vector<16x1xf32>
    %138 = arith.mulf %137, %136 : vector<16x1xf32>
    %139 = vector.broadcast %138 : vector<16x1xf32> to vector<16x32xf32>
    %140 = arith.mulf %126, %139 : vector<16x32xf32>
    %141 = math.roundeven %140 : vector<16x32xf32>
    %cst_46 = arith.constant -1.280000e+02 : f32
    %cst_47 = arith.constant 1.270000e+02 : f32
    %142 = vector.broadcast %cst_46 : f32 to vector<16x32xf32>
    %143 = arith.maximumf %142, %141 : vector<16x32xf32>
    %144 = vector.broadcast %cst_47 : f32 to vector<16x32xf32>
    %145 = arith.minimumf %144, %143 : vector<16x32xf32>
    %cst_48 = arith.constant 0.00787401571 : f32
    %146 = vector.broadcast %cst_48 : f32 to vector<16x1xf32>
    %147 = arith.mulf %131, %146 : vector<16x1xf32>
    %148 = arith.truncf %145 : vector<16x32xf32> to vector<16x32xbf16>
    %cst_49 = arith.constant dense<0.000000e+00> : vector<16x32xf32>
    %149 = tpu.matmul %148, %109, %cst_49 {dimension_numbers = #tpu.dot_dimension_numbers<[1], [0], [0], [1], [0, 0, 1, 1], [], []>} : vector<16x32xbf16>, vector<32x32xbf16>, vector<16x32xf32> -> vector<16x32xf32>
    %cst_50 = arith.constant 0.015900841 : f32
    %150 = vector.broadcast %cst_50 : f32 to vector<16x1xf32>
    %151 = arith.mulf %147, %150 : vector<16x1xf32>
    %152 = vector.broadcast %151 : vector<16x1xf32> to vector<16x32xf32>
    %153 = arith.mulf %149, %152 : vector<16x32xf32>
    %154 = vector.extract_strided_slice %108 {offsets = [8, 8], sizes = [16, 16], strides = [1, 1]} : vector<32x32xf32> to vector<16x16xf32>
    %cst_51 = arith.constant dense<0xFF800000> : vector<16xf32>
    %155 = vector.multi_reduction <maximumf>, %154, %cst_51 [1] : vector<16x16xf32> to vector<16xf32>
    %156 = vector.shape_cast %155 : vector<16xf32> to vector<16x1xf32>
    %157 = vector.broadcast %156 : vector<16x1xf32> to vector<16x16xf32>
    %158 = arith.subf %154, %157 : vector<16x16xf32>
    %159 = math.exp %158 : vector<16x16xf32>
    %cst_52 = arith.constant dense<0.000000e+00> : vector<16xf32>
    %160 = vector.multi_reduction <add>, %159, %cst_52 [1] : vector<16x16xf32> to vector<16xf32>
    %161 = vector.shape_cast %160 : vector<16xf32> to vector<16x1xf32>
    %162 = tpu.reciprocal %161 {approx = true} : vector<16x1xf32> -> vector<16x1xf32>
    %163 = arith.mulf %161, %162 : vector<16x1xf32>
    %cst_53 = arith.constant 2.000000e+00 : f32
    %164 = vector.broadcast %cst_53 : f32 to vector<16x1xf32>
    %165 = arith.subf %164, %163 : vector<16x1xf32>
    %166 = arith.mulf %162, %165 : vector<16x1xf32>
    %167 = vector.broadcast %166 : vector<16x1xf32> to vector<16x16xf32>
    %168 = arith.mulf %159, %167 : vector<16x16xf32>
    %169 = vector.extract_strided_slice %99 {offsets = [8, 0], sizes = [16, 32], strides = [1, 1]} : vector<32x32xf32> to vector<16x32xf32>
    %cst_54 = arith.constant dense<0.000000e+00> : vector<16x32xf32>
    %170 = tpu.matmul %168, %169, %cst_54 {dimension_numbers = #tpu.dot_dimension_numbers<[1], [0], [0], [1], [0, 0, 1, 1], [], []>} : vector<16x16xf32>, vector<16x32xf32>, vector<16x32xf32> -> vector<16x32xf32>
    %171 = math.absf %170 : vector<16x32xf32>
    %cst_55 = arith.constant dense<0xFF800000> : vector<16xf32>
    %172 = vector.multi_reduction <maximumf>, %171, %cst_55 [1] : vector<16x32xf32> to vector<16xf32>
    %173 = vector.shape_cast %172 : vector<16xf32> to vector<16x1xf32>
    %cst_56 = arith.constant 9.99999974E-6 : f32
    %174 = vector.broadcast %cst_56 : f32 to vector<16x1xf32>
    %175 = arith.maximumf %173, %174 : vector<16x1xf32>
    %176 = tpu.reciprocal %175 {approx = true} : vector<16x1xf32> -> vector<16x1xf32>
    %177 = arith.mulf %175, %176 : vector<16x1xf32>
    %cst_57 = arith.constant 2.000000e+00 : f32
    %178 = vector.broadcast %cst_57 : f32 to vector<16x1xf32>
    %179 = arith.subf %178, %177 : vector<16x1xf32>
    %180 = arith.mulf %176, %179 : vector<16x1xf32>
    %cst_58 = arith.constant 1.270000e+02 : f32
    %181 = vector.broadcast %cst_58 : f32 to vector<16x1xf32>
    %182 = arith.mulf %181, %180 : vector<16x1xf32>
    %183 = vector.broadcast %182 : vector<16x1xf32> to vector<16x32xf32>
    %184 = arith.mulf %170, %183 : vector<16x32xf32>
    %185 = math.roundeven %184 : vector<16x32xf32>
    %cst_59 = arith.constant -1.280000e+02 : f32
    %cst_60 = arith.constant 1.270000e+02 : f32
    %186 = vector.broadcast %cst_59 : f32 to vector<16x32xf32>
    %187 = arith.maximumf %186, %185 : vector<16x32xf32>
    %188 = vector.broadcast %cst_60 : f32 to vector<16x32xf32>
    %189 = arith.minimumf %188, %187 : vector<16x32xf32>
    %cst_61 = arith.constant 0.00787401571 : f32
    %190 = vector.broadcast %cst_61 : f32 to vector<16x1xf32>
    %191 = arith.mulf %175, %190 : vector<16x1xf32>
    %192 = arith.truncf %189 : vector<16x32xf32> to vector<16x32xbf16>
    %cst_62 = arith.constant dense<0.000000e+00> : vector<16x32xf32>
    %193 = tpu.matmul %192, %109, %cst_62 {dimension_numbers = #tpu.dot_dimension_numbers<[1], [0], [0], [1], [0, 0, 1, 1], [], []>} : vector<16x32xbf16>, vector<32x32xbf16>, vector<16x32xf32> -> vector<16x32xf32>
    %cst_63 = arith.constant 0.015900841 : f32
    %194 = vector.broadcast %cst_63 : f32 to vector<16x1xf32>
    %195 = arith.mulf %191, %194 : vector<16x1xf32>
    %196 = vector.broadcast %195 : vector<16x1xf32> to vector<16x32xf32>
    %197 = arith.mulf %193, %196 : vector<16x32xf32>
    %198 = vector.extract_strided_slice %108 {offsets = [16, 16], sizes = [16, 16], strides = [1, 1]} : vector<32x32xf32> to vector<16x16xf32>
    %cst_64 = arith.constant dense<0xFF800000> : vector<16xf32>
    %199 = vector.multi_reduction <maximumf>, %198, %cst_64 [1] : vector<16x16xf32> to vector<16xf32>
    %200 = vector.shape_cast %199 : vector<16xf32> to vector<16x1xf32>
    %201 = vector.broadcast %200 : vector<16x1xf32> to vector<16x16xf32>
    %202 = arith.subf %198, %201 : vector<16x16xf32>
    %203 = math.exp %202 : vector<16x16xf32>
    %cst_65 = arith.constant dense<0.000000e+00> : vector<16xf32>
    %204 = vector.multi_reduction <add>, %203, %cst_65 [1] : vector<16x16xf32> to vector<16xf32>
    %205 = vector.shape_cast %204 : vector<16xf32> to vector<16x1xf32>
    %206 = tpu.reciprocal %205 {approx = true} : vector<16x1xf32> -> vector<16x1xf32>
    %207 = arith.mulf %205, %206 : vector<16x1xf32>
    %cst_66 = arith.constant 2.000000e+00 : f32
    %208 = vector.broadcast %cst_66 : f32 to vector<16x1xf32>
    %209 = arith.subf %208, %207 : vector<16x1xf32>
    %210 = arith.mulf %206, %209 : vector<16x1xf32>
    %211 = vector.broadcast %210 : vector<16x1xf32> to vector<16x16xf32>
    %212 = arith.mulf %203, %211 : vector<16x16xf32>
    %213 = vector.extract_strided_slice %99 {offsets = [16, 0], sizes = [16, 32], strides = [1, 1]} : vector<32x32xf32> to vector<16x32xf32>
    %cst_67 = arith.constant dense<0.000000e+00> : vector<16x32xf32>
    %214 = tpu.matmul %212, %213, %cst_67 {dimension_numbers = #tpu.dot_dimension_numbers<[1], [0], [0], [1], [0, 0, 1, 1], [], []>} : vector<16x16xf32>, vector<16x32xf32>, vector<16x32xf32> -> vector<16x32xf32>
    %215 = math.absf %214 : vector<16x32xf32>
    %cst_68 = arith.constant dense<0xFF800000> : vector<16xf32>
    %216 = vector.multi_reduction <maximumf>, %215, %cst_68 [1] : vector<16x32xf32> to vector<16xf32>
    %217 = vector.shape_cast %216 : vector<16xf32> to vector<16x1xf32>
    %cst_69 = arith.constant 9.99999974E-6 : f32
    %218 = vector.broadcast %cst_69 : f32 to vector<16x1xf32>
    %219 = arith.maximumf %217, %218 : vector<16x1xf32>
    %220 = tpu.reciprocal %219 {approx = true} : vector<16x1xf32> -> vector<16x1xf32>
    %221 = arith.mulf %219, %220 : vector<16x1xf32>
    %cst_70 = arith.constant 2.000000e+00 : f32
    %222 = vector.broadcast %cst_70 : f32 to vector<16x1xf32>
    %223 = arith.subf %222, %221 : vector<16x1xf32>
    %224 = arith.mulf %220, %223 : vector<16x1xf32>
    %cst_71 = arith.constant 1.270000e+02 : f32
    %225 = vector.broadcast %cst_71 : f32 to vector<16x1xf32>
    %226 = arith.mulf %225, %224 : vector<16x1xf32>
    %227 = vector.broadcast %226 : vector<16x1xf32> to vector<16x32xf32>
    %228 = arith.mulf %214, %227 : vector<16x32xf32>
    %229 = math.roundeven %228 : vector<16x32xf32>
    %cst_72 = arith.constant -1.280000e+02 : f32
    %cst_73 = arith.constant 1.270000e+02 : f32
    %230 = vector.broadcast %cst_72 : f32 to vector<16x32xf32>
    %231 = arith.maximumf %230, %229 : vector<16x32xf32>
    %232 = vector.broadcast %cst_73 : f32 to vector<16x32xf32>
    %233 = arith.minimumf %232, %231 : vector<16x32xf32>
    %cst_74 = arith.constant 0.00787401571 : f32
    %234 = vector.broadcast %cst_74 : f32 to vector<16x1xf32>
    %235 = arith.mulf %219, %234 : vector<16x1xf32>
    %236 = arith.truncf %233 : vector<16x32xf32> to vector<16x32xbf16>
    %cst_75 = arith.constant dense<0.000000e+00> : vector<16x32xf32>
    %237 = tpu.matmul %236, %109, %cst_75 {dimension_numbers = #tpu.dot_dimension_numbers<[1], [0], [0], [1], [0, 0, 1, 1], [], []>} : vector<16x32xbf16>, vector<32x32xbf16>, vector<16x32xf32> -> vector<16x32xf32>
    %cst_76 = arith.constant 0.015900841 : f32
    %238 = vector.broadcast %cst_76 : f32 to vector<16x1xf32>
    %239 = arith.mulf %235, %238 : vector<16x1xf32>
    %240 = vector.broadcast %239 : vector<16x1xf32> to vector<16x32xf32>
    %241 = arith.mulf %237, %240 : vector<16x32xf32>
    %242 = vector.extract_strided_slice %108 {offsets = [24, 24], sizes = [8, 8], strides = [1, 1]} : vector<32x32xf32> to vector<8x8xf32>
    %cst_77 = arith.constant dense<0xFF800000> : vector<8xf32>
    %243 = vector.multi_reduction <maximumf>, %242, %cst_77 [1] : vector<8x8xf32> to vector<8xf32>
    %244 = vector.shape_cast %243 : vector<8xf32> to vector<8x1xf32>
    %245 = vector.broadcast %244 : vector<8x1xf32> to vector<8x8xf32>
    %246 = arith.subf %242, %245 : vector<8x8xf32>
    %247 = math.exp %246 : vector<8x8xf32>
    %cst_78 = arith.constant dense<0.000000e+00> : vector<8xf32>
    %248 = vector.multi_reduction <add>, %247, %cst_78 [1] : vector<8x8xf32> to vector<8xf32>
    %249 = vector.shape_cast %248 : vector<8xf32> to vector<8x1xf32>
    %250 = tpu.reciprocal %249 {approx = true} : vector<8x1xf32> -> vector<8x1xf32>
    %251 = arith.mulf %249, %250 : vector<8x1xf32>
    %cst_79 = arith.constant 2.000000e+00 : f32
    %252 = vector.broadcast %cst_79 : f32 to vector<8x1xf32>
    %253 = arith.subf %252, %251 : vector<8x1xf32>
    %254 = arith.mulf %250, %253 : vector<8x1xf32>
    %255 = vector.broadcast %254 : vector<8x1xf32> to vector<8x8xf32>
    %256 = arith.mulf %247, %255 : vector<8x8xf32>
    %257 = vector.extract_strided_slice %99 {offsets = [24, 0], sizes = [8, 32], strides = [1, 1]} : vector<32x32xf32> to vector<8x32xf32>
    %cst_80 = arith.constant dense<0.000000e+00> : vector<8x32xf32>
    %258 = tpu.matmul %256, %257, %cst_80 {dimension_numbers = #tpu.dot_dimension_numbers<[1], [0], [0], [1], [0, 0, 1, 1], [], []>} : vector<8x8xf32>, vector<8x32xf32>, vector<8x32xf32> -> vector<8x32xf32>
    %259 = math.absf %258 : vector<8x32xf32>
    %cst_81 = arith.constant dense<0xFF800000> : vector<8xf32>
    %260 = vector.multi_reduction <maximumf>, %259, %cst_81 [1] : vector<8x32xf32> to vector<8xf32>
    %261 = vector.shape_cast %260 : vector<8xf32> to vector<8x1xf32>
    %cst_82 = arith.constant 9.99999974E-6 : f32
    %262 = vector.broadcast %cst_82 : f32 to vector<8x1xf32>
    %263 = arith.maximumf %261, %262 : vector<8x1xf32>
    %264 = tpu.reciprocal %263 {approx = true} : vector<8x1xf32> -> vector<8x1xf32>
    %265 = arith.mulf %263, %264 : vector<8x1xf32>
    %cst_83 = arith.constant 2.000000e+00 : f32
    %266 = vector.broadcast %cst_83 : f32 to vector<8x1xf32>
    %267 = arith.subf %266, %265 : vector<8x1xf32>
    %268 = arith.mulf %264, %267 : vector<8x1xf32>
    %cst_84 = arith.constant 1.270000e+02 : f32
    %269 = vector.broadcast %cst_84 : f32 to vector<8x1xf32>
    %270 = arith.mulf %269, %268 : vector<8x1xf32>
    %271 = vector.broadcast %270 : vector<8x1xf32> to vector<8x32xf32>
    %272 = arith.mulf %258, %271 : vector<8x32xf32>
    %273 = math.roundeven %272 : vector<8x32xf32>
    %cst_85 = arith.constant -1.280000e+02 : f32
    %cst_86 = arith.constant 1.270000e+02 : f32
    %274 = vector.broadcast %cst_85 : f32 to vector<8x32xf32>
    %275 = arith.maximumf %274, %273 : vector<8x32xf32>
    %276 = vector.broadcast %cst_86 : f32 to vector<8x32xf32>
    %277 = arith.minimumf %276, %275 : vector<8x32xf32>
    %cst_87 = arith.constant 0.00787401571 : f32
    %278 = vector.broadcast %cst_87 : f32 to vector<8x1xf32>
    %279 = arith.mulf %263, %278 : vector<8x1xf32>
    %280 = arith.truncf %277 : vector<8x32xf32> to vector<8x32xbf16>
    %cst_88 = arith.constant dense<0.000000e+00> : vector<8x32xf32>
    %281 = tpu.matmul %280, %109, %cst_88 {dimension_numbers = #tpu.dot_dimension_numbers<[1], [0], [0], [1], [0, 0, 1, 1], [], []>} : vector<8x32xbf16>, vector<32x32xbf16>, vector<8x32xf32> -> vector<8x32xf32>
    %cst_89 = arith.constant 0.015900841 : f32
    %282 = vector.broadcast %cst_89 : f32 to vector<8x1xf32>
    %283 = arith.mulf %279, %282 : vector<8x1xf32>
    %284 = vector.broadcast %283 : vector<8x1xf32> to vector<8x32xf32>
    %285 = arith.mulf %281, %284 : vector<8x32xf32>
    %286 = vector.extract_strided_slice %153 {offsets = [0, 0], sizes = [8, 32], strides = [1, 1]} : vector<16x32xf32> to vector<8x32xf32>
    %cst_90 = arith.constant 1.000000e+00 : f32
    %287 = vector.broadcast %cst_90 : f32 to vector<8x32xf32>
    %288 = arith.mulf %286, %287 : vector<8x32xf32>
    %c0_91 = arith.constant 0 : index
    %c0_92 = arith.constant 0 : index
    %c0_93 = arith.constant 0 : index
    %289 = vector.load %arg5[%c0_91, %c0_92, %c0_93] : memref<1x32x32xf32, #tpu.memory_space<vmem>>, vector<1x8x32xf32>
    %290 = vector.shape_cast %289 : vector<1x8x32xf32> to vector<8x32xf32>
    %291 = vector.shape_cast %288 : vector<8x32xf32> to vector<1x8x32xf32>
    tpu.vector_store %arg5[%c0_91, %c0_92, %c0_93], %291 {strides = array<i32>} : memref<1x32x32xf32, #tpu.memory_space<vmem>>, vector<1x8x32xf32>,
    %292 = vector.extract_strided_slice %153 {offsets = [8, 0], sizes = [8, 32], strides = [1, 1]} : vector<16x32xf32> to vector<8x32xf32>
    %293 = vector.extract_strided_slice %197 {offsets = [0, 0], sizes = [8, 32], strides = [1, 1]} : vector<16x32xf32> to vector<8x32xf32>
    %294 = arith.addf %292, %293 : vector<8x32xf32>
    %cst_94 = arith.constant 5.000000e-01 : f32
    %295 = vector.broadcast %cst_94 : f32 to vector<8x32xf32>
    %296 = arith.mulf %294, %295 : vector<8x32xf32>
    %c0_95 = arith.constant 0 : index
    %c8 = arith.constant 8 : index
    %c0_96 = arith.constant 0 : index
    %297 = vector.load %arg5[%c0_95, %c8, %c0_96] : memref<1x32x32xf32, #tpu.memory_space<vmem>>, vector<1x8x32xf32>
    %298 = vector.shape_cast %297 : vector<1x8x32xf32> to vector<8x32xf32>
    %299 = vector.shape_cast %296 : vector<8x32xf32> to vector<1x8x32xf32>
    tpu.vector_store %arg5[%c0_95, %c8, %c0_96], %299 {strides = array<i32>} : memref<1x32x32xf32, #tpu.memory_space<vmem>>, vector<1x8x32xf32>,
    %300 = vector.extract_strided_slice %197 {offsets = [8, 0], sizes = [8, 32], strides = [1, 1]} : vector<16x32xf32> to vector<8x32xf32>
    %301 = vector.extract_strided_slice %241 {offsets = [0, 0], sizes = [8, 32], strides = [1, 1]} : vector<16x32xf32> to vector<8x32xf32>
    %302 = arith.addf %300, %301 : vector<8x32xf32>
    %cst_97 = arith.constant 5.000000e-01 : f32
    %303 = vector.broadcast %cst_97 : f32 to vector<8x32xf32>
    %304 = arith.mulf %302, %303 : vector<8x32xf32>
    %c0_98 = arith.constant 0 : index
    %c16 = arith.constant 16 : index
    %c0_99 = arith.constant 0 : index
    %305 = vector.load %arg5[%c0_98, %c16, %c0_99] : memref<1x32x32xf32, #tpu.memory_space<vmem>>, vector<1x8x32xf32>
    %306 = vector.shape_cast %305 : vector<1x8x32xf32> to vector<8x32xf32>
    %307 = vector.shape_cast %304 : vector<8x32xf32> to vector<1x8x32xf32>
    tpu.vector_store %arg5[%c0_98, %c16, %c0_99], %307 {strides = array<i32>} : memref<1x32x32xf32, #tpu.memory_space<vmem>>, vector<1x8x32xf32>,
    %308 = vector.extract_strided_slice %241 {offsets = [8, 0], sizes = [8, 32], strides = [1, 1]} : vector<16x32xf32> to vector<8x32xf32>
    %309 = arith.addf %308, %285 : vector<8x32xf32>
    %cst_100 = arith.constant 5.000000e-01 : f32
    %310 = vector.broadcast %cst_100 : f32 to vector<8x32xf32>
    %311 = arith.mulf %309, %310 : vector<8x32xf32>
    %c0_101 = arith.constant 0 : index
    %c24 = arith.constant 24 : index
    %c0_102 = arith.constant 0 : index
    %312 = vector.load %arg5[%c0_101, %c24, %c0_102] : memref<1x32x32xf32, #tpu.memory_space<vmem>>, vector<1x8x32xf32>
    %313 = vector.shape_cast %312 : vector<1x8x32xf32> to vector<8x32xf32>
    %314 = vector.shape_cast %311 : vector<8x32xf32> to vector<1x8x32xf32>
    tpu.vector_store %arg5[%c0_101, %c24, %c0_102], %314 {strides = array<i32>} : memref<1x32x32xf32, #tpu.memory_space<vmem>>, vector<1x8x32xf32>,
    return
  }
  func.func @transform_0(%arg0: i32) -> (i32, i32, i32) {
    %c0_i32 = arith.constant 0 : i32
    %c0_i32_0 = arith.constant 0 : i32
    %c0_i32_1 = arith.constant 0 : i32
    return %arg0, %c0_i32, %c0_i32_0 : i32, i32, i32
  }
  func.func @transform_1(%arg0: i32) -> (i32, i32) {
    %c0_i32 = arith.constant 0 : i32
    %c0_i32_0 = arith.constant 0 : i32
    %c0_i32_1 = arith.constant 0 : i32
    return %c0_i32, %c0_i32_0 : i32, i32
  }
  func.func @transform_2(%arg0: i32) -> (i32, i32) {
    %c0_i32 = arith.constant 0 : i32
    %c0_i32_0 = arith.constant 0 : i32
    %c0_i32_1 = arith.constant 0 : i32
    return %c0_i32, %c0_i32_0 : i32, i32
  }
  func.func @transform_3(%arg0: i32) -> (i32, i32) {
    %c0_i32 = arith.constant 0 : i32
    %c0_i32_0 = arith.constant 0 : i32
    %c0_i32_1 = arith.constant 0 : i32
    return %c0_i32, %c0_i32_0 : i32, i32
  }
  func.func @transform_4(%arg0: i32) -> (i32, i32, i32) {
    %c0_i32 = arith.constant 0 : i32
    %c0_i32_0 = arith.constant 0 : i32
    %c0_i32_1 = arith.constant 0 : i32
    return %arg0, %c0_i32, %c0_i32_0 : i32, i32, i32
  }
}

</mosaic_0001>

<bundles_post_ra>
// kernel: tpu_custom_call.1
= control target key start
LH: loop header
LB: loop body
LE: loop exit
PB: predicated region body
PF: predicated region fallthrough
CT: control target
= control target key end

     0   :  { %9 = vsyncpa [#allocation3], 0  ;;  %s2203_s0 = inlined_call_operand.hbm [shape: f32[2,32,32], index: 0, kind: input, shape index: {}]   ;;  %s2204_s1 = inlined_call_operand.hbm [shape: bf16[32,96], index: 1, kind: input, shape index: {}]   ;;  %s2205_s2 = inlined_call_operand.vmem [shape: f32[1,96], index: 2, kind: input, shape index: {}]   ;;  %s2206_s3 = inlined_call_operand.hbm [shape: bf16[32,32], index: 3, kind: input, shape index: {}]   ;;  %s2207_s4 = inlined_call_operand.hbm [shape: f32[2,32,32], index: 4, kind: output, shape index: {}]  }
   0x1   :  { %11 = vsyncpa [#allocation3 + $0x1], 0 }
   0x2   :  { %12 = vsyncpa [#allocation6], 0 }
   0x3   :  { %13 = vsyncpa [#allocation4], 0 }
   0x4   :  { %15 = vsyncpa [#allocation4 + $0x1], 0  ;;  %s1797_s15 = smov 0   ;;  %s1799_s16 = smov 0  }
   0x5   :  { %s1801_s17 = smov 0   ;;  %s1803_s18 = smov 0  }
   0x6 LB: > { %s1818_s19 = sadd.s32 4294967295, %s1757_s18   ;;  %s1205_s20 = sadd.s32 4294967294, %s1757_s18   ;;  %s1757_s18 = sphi %s1803_s18, %s2219_s18   ;;  %s1753_s17 = sphi %s1801_s17, %s2218_s17   ;;  %s1749_s16 = sphi %s1799_s16, %s2217_s16   ;;  %s1745_s15 = sphi %s1797_s15, %s2216_s15  }
   0x7   : > { %p41_p0 = scmp.ne.s32.totalorder %s1749_s16, %s1745_s15  ;;  %p42_p1 = scmp.eq.s32.totalorder %s1818_s19, 0 }
   0x8   : > { %p128_p2 = scmp.eq.s32.totalorder %s1818_s19, 1  ;;  %p134_p3 = scmp.eq.s32.totalorder %s1205_s20, 1 }
   0x9   : > { %p1827_p4 = por %p42_p1, %p41_p0  ;;  %p1206_p5 = scmp.ge.s32.totalorder %s1757_s18, 1 }
   0xa   : > { %p1832_p6 = por %p134_p3, %p41_p0  ;;  %p141_p7 = scmp.lt.s32.totalorder %s1757_s18, 3 }
   0xb   : > { %s152_s25 = sshll.u32 %s2204_s1, 4  ;;  %s1759_s27 = smov [#allocation5]   ;;  %s153_s25 = int_to_ptr.hbm [resolvable:$true] %s152_s25 }
   0xc   : > { %p1840_p8 = pnand %p1206_p5, %p141_p7  ;;  %s154_s28 = sshll.u32 %s1759_s27, 4  ;;  %s155_s28 = int_to_ptr.vmem [resolvable:$true] %s154_s28 }
   0xd   : > { %s169_s5 = sshll.u32 %s2206_s3, 4  ;;  %s1760_s6 = smov 64   ;;  %s170_s5 = int_to_ptr.hbm [resolvable:$true] %s169_s5 }
   0xe   : > { %p1456_p9 = pneg %p1840_p8  ;;  %s1761_s7 = smov 4  }
   0xf   : > { %s1762_s8 = smov [#allocation7]   ;;  %s1853_s10 = sadd.s32 1, %s1757_s18  }
  0x10   : > { %p1457_p10 = pnand %p1456_p9, %p42_p1  ;;  %s171_s9 = sshll.u32 %s1762_s8, 4  ;;  %s172_s9 = int_to_ptr.vmem [resolvable:$true] %s171_s9 }
  0x11   : > { %s28_s11 = sadd.s32 1, %s1753_s17  ;;  %s25_s12 = ssub.s32 %s1757_s18, %s1853_s10 }
  0x12   : > { %1459 = dma.hbm_to_vmem [thread:$0]  (!%p1457_p10), %s153_s25, 256, %s155_s28, [#allocation6], %s1760_s6, %s1760_s6, %s1761_s7  }
  0x13   : > { %1462 = dma.hbm_to_vmem [thread:$0]  (!%p1457_p10), %s170_s5, 256, %s172_s9, [#allocation6], %s1760_s6, %s1760_s6, %s1761_s7  }
  0x14   : > { %p35_p12 = scmp.ne.s32.totalorder %s1753_s17, %s1749_s16  ;;  %p26_p13 = scmp.eq.s32.totalorder %s25_s12, 0 }
  0x15   : > { %p36_p0 = scmp.eq.s32.totalorder %s1757_s18, 0  ;;  %p1473_p5 = scmp.lt.s32.totalorder %s1757_s18, 2 }
  0x16   : > { %p1863_p3 = por %p128_p2, %p35_p12  ;;  %s185_s20 = sand.u32 1, %s1753_s17  }
  0x17   : > { %s1869_s14 = scalar_select %p26_p13, %s1753_s17, %s28_s11  }
  0x18   : > { %p37_p7 = por %p36_p0, %p35_p12  ;;  %s1210_s23 = sshll.u32 %s185_s20, 5 }
  0x19   : > { %s1254_s24 = sshll.u32 %s1757_s18, 5  ;;  %s189_s29 = scalar_lea.vmem [#allocation2], %s1210_s23 }
  0x1a   : > { %s194_s28 = scalar_lea.hbm %s2203_s0, %s1254_s24  ;;  %s197_s30 = sshll.u32 %s189_s29, 4  ;;  %s198_s30 = int_to_ptr.vmem [resolvable:$true] %s197_s30 }
  0x1b   : > { %s195_s5 = sshll.u32 %s194_s28, 4  ;;  %p1876_p2 = pnand %p1473_p5, %p37_p7  ;;  %s196_s5 = int_to_ptr.hbm [resolvable:$true] %s195_s5 }
  0x1c   : > { %s186_s7 = scalar_lea.sflag [#allocation3], %s185_s20  ;;  %s1657_s8 = sshra.s32 %s196_s5, 4  ;;  %s1658_s8 = int_to_ptr.hbm [resolvable:$true] %s1657_s8 }
  0x1d   : > { %s1659_s9 = scalar_lea.hbm %s1658_s8, 32  ;;  %p1661_p10 = pneg %p1876_p2 }
  0x1e   : > { %p1660_p9 = scmp.ne.s32.totalorder %s1658_s8, %s1659_s9  ;;  %s1664_s23 = scalar_lea.hbm %s2203_s0, 64 }
  0x1f   : > { %p1665_p0 = scmp.lt.s32.totalorder %s1658_s8, %s2203_s0  ;;  %p1666_p5 = scmp.lt.s32.totalorder %s1664_s23, %s1659_s9 }
  0x20   : > { %p1662_p12 = pnand %p1661_p10, %p1660_p9 }
  0x21   : > { %p1667_p7 = por %p1666_p5, %p1665_p0 }
  0x22   : > { %p1663_p13 = pneg %p1662_p12 }
  0x24   : > { %p1668_p11 = pnand %p1667_p7, %p1663_p13 }
  0x26   : > { %1671 = shalt.err (!%p1668_p11)
}
  0x27   : > { %s1763_s20 = smov 128   ;;  %s1764_s27 = smov 8  }
  0x28   : > { %1466 = dma.hbm_to_vmem [thread:$0]  (!%p1876_p2), %s196_s5, 512, %s198_s30, %s186_s7, %s1763_s20, %s1763_s20, %s1764_s27  }
  0x29   : > { %209 = sbr.rel (%p1840_p8) target bundleno = 1810 (0x712), region = 36  ;;  %s1893_s28 = sand.u32 (!%p1840_p8), 1, %s1749_s16  }
  0x2a   : > { %s1214_s29 = sshll.u32 (!%p1840_p8), %s1893_s28, 5  ;;  %s212_s8 = scalar_lea.sflag (!%p1840_p8), [#allocation3], %s1893_s28 }
  0x2b   : > { %s215_s9 = scalar_lea.vmem (!%p1840_p8), [#allocation2], %s1214_s29 }
  0x2e   : > { %1732 = dma.done.wait (%p1827_p4), %s212_s8, 512  }
  0x2f   : > { %1734 = vsyncadd (%p1827_p4), %s212_s8, 4294966784 }
  0x30   : > { %1736 = dma.done.wait (%p42_p1), [#allocation6], 512  }
  0x31   : > { %1738 = vsyncadd (%p42_p1), [#allocation6], 4294966784  ;;  %v254_v0 = vld [vmem:[%s215_s9 + $0x10] sm:$0xff]  ;;  %vm260_vm0 = vcmask 261120   ;;  %v252_v1 = vld [vmem:[%s215_s9] sm:$0xff]  ;;  %s1765_s30 = smov 96  }
  0x32   : > { %v258_v2 = vand.u32 2147483647, %v254_v0  ;;  %v256_v3 = vand.u32 2147483647, %v252_v1  ;;  %v255_v4 = vld [vmem:[%s215_s9 + $0x18] sm:$0xff]  ;;  %v253_v5 = vld [vmem:[%s215_s9 + $0x8] sm:$0xff] }
  0x33   : > { %v259_v8 = vand.u32 2147483647, %v255_v4  ;;  %v257_v9 = vand.u32 2147483647, %v253_v5  ;;  %v1256_v12 = vld [vmem:[#allocation5 + $0x8] sm:$0xff]  ;;  %v1255_v13 = vld [vmem:[#allocation5] sm:$0xff] }
  0x34   : > { %v267_v6 = vsel %vm260_vm0, %v258_v2, -inf  ;;  %v261_v7 = vsel %vm260_vm0, %v256_v3, -inf  ;;  %347 = vmatpush.bf16.msra.mxu0 %v1256_v12  ;;  %vm520_vm5 = vcmask 785920   ;;  %s1766_s5 = smov 120   ;;  %s1767_s6 = smov 112  }
  0x35   : > { %268 = vmax.xlane.f32.xlu1 %v267_v6  ;;  %262 = vmax.xlane.f32.xlu0 %v261_v7  ;;  %v270_v10 = vsel %vm260_vm0, %v259_v8, -inf  ;;  %v264_v11 = vsel %vm260_vm0, %v257_v9, -inf  ;;  %s1768_s7 = smov 104   ;;  %s1769_s11 = smov 64  }
  0x36   : > { %s2153_s12 = scalar_lea.vmem [#allocation8], %s1214_s29  ;;  %s1259_s23 = sshll.u32 %s1818_s19, 5 }
  0x37   : > { %s1109_s20 = scalar_lea.hbm %s2207_s4, %s1259_s23  ;;  %s1110_s27 = sshll.u32 %s2153_s12, 4  ;;  %s1111_s27 = int_to_ptr.vmem [resolvable:$true] %s1110_s27 }
  0x38   : > { %348 = vmatpush.bf16.msra.mxu0 %v1255_v13  ;;  %s1112_s29 = sshll.u32 %s1109_s20, 4  ;;  %s1098_s19 = scalar_lea.sflag [#allocation4], %s1893_s28  ;;  %s1113_s29 = int_to_ptr.hbm [resolvable:$true] %s1112_s29 }
  0x39   : > { %s1701_s8 = sshra.s32 %s1113_s29, 4  ;;  %s1702_s8 = int_to_ptr.hbm [resolvable:$true] %s1701_s8 }
  0x3a   : > { %s1703_s9 = scalar_lea.hbm %s1702_s8, 32  ;;  %p1708_p11 = scmp.lt.s32.totalorder %s1702_s8, %s2207_s4 }
  0x3b   : > { %p1704_p1 = scmp.ne.s32.totalorder %s1702_s8, %s1703_s9 }
  0x3d   : > { %271 = vmax.xlane.f32.xlu1 %v270_v10  ;;  %265 = vmax.xlane.f32.xlu0 %v264_v11  ;;  %p1705_p4 = pnand %p1704_p1, %p1863_p3 }
  0x3f   : > { %p1706_p8 = pneg %p1705_p4 }
  0xa8   : > { %v269_v14 = vpop.xlane.xlu1 %268  ;;  %v263_v15 = vpop.xlane.xlu0 %262 }
  0xa9   : > { %v1911_v16 = vmax.f32 %v269_v14, 1e-05  ;;  %v1913_v17 = vmax.f32 %v263_v15, 1e-05 }
  0xab   : > { %1529 = vrcp.f32 %v1911_v16 }
  0xac   : > { %1531 = vrcp.f32 %v1913_v17 }
  0xb0   : > { %v272_v18 = vpop.xlane.xlu1 %271  ;;  %v266_v19 = vpop.xlane.xlu0 %265 }
  0xb1   : > { %v1530_v20 = vpop.eup %1529  ;;  %v1917_v21 = vmax.f32 %v272_v18, 1e-05  ;;  %v1919_v22 = vmax.f32 %v266_v19, 1e-05 }
  0xb2   : > { %v1532_v23 = vpop.eup %1531  ;;  %v283_v25 = vmul.f32 %v1530_v20, %v1911_v16 }
  0xb3   : > { %v281_v24 = vmul.f32 %v1532_v23, %v1913_v17  ;;  %1533 = vrcp.f32 %v1917_v21 }
  0xb4   : > { %1535 = vrcp.f32 %v1919_v22  ;;  %v287_v29 = vsub.f32 2.0, %v283_v25  ;;  %v1528_v25 = vld [vmem:[%s2205_s2] ss:$0 sm:$0xff] }
  0xb5   : > { %v285_v26 = vsub.f32 2.0, %v281_v24  ;;  %v313_v24 = vmul.f32 0.007874016, %v1913_v17  ;;  %v315_v17 = vmul.f32 0.007874016, %v1911_v16 }
  0xb6   : > { %v291_v36 = vmul.f32 %v1530_v20, %v287_v29  ;;  %v314_v29 = vmul.f32 0.007874016, %v1919_v22 }
  0xb7   : > { %v289_v27 = vmul.f32 %v1532_v23, %v285_v26 }
  0xb8   : > { %v295_v43 = vmul.f32 127.0, %v291_v36  ;;  %v316_v36 = vmul.f32 0.007874016, %v1917_v21 }
  0xb9   : > { %v1534_v28 = vpop.eup %1533  ;;  %v293_v30 = vmul.f32 127.0, %v289_v27 }
  0xba   : > { %v1536_v31 = vpop.eup %1535  ;;  %v284_v32 = vmul.f32 %v1534_v28, %v1917_v21  ;;  %v299_v50 = vmul.f32 %v295_v43, %v254_v0 }
  0xbb   : > { %v297_v33 = vmul.f32 %v293_v30, %v252_v1  ;;  %v282_v34 = vmul.f32 %v1536_v31, %v1919_v22 }
  0xbc   : > { %v288_v35 = vsub.f32 2.0, %v284_v32  ;;  %v1278_v59 = vcvt.f32.s32 %v299_v50  ;;  %v1281_v8 = vand.u32 2147483648, %v299_v50  ;;  %v1276_v10 = vand.u32 2147483647, %v299_v50 }
  0xbd   : > { %v286_v37 = vsub.f32 2.0, %v282_v34  ;;  %v1262_v38 = vcvt.f32.s32 %v297_v33  ;;  %v1265_v48 = vand.u32 2147483648, %v297_v33  ;;  %v1260_v49 = vand.u32 2147483647, %v297_v33 }
  0xbe   : > { %v292_v39 = vmul.f32 %v1534_v28, %v288_v35  ;;  %v1279_v1 = vcvt.s32.f32 %v1278_v59  ;;  %vm1277_vm4 = vcmp.lt.f32.partialorder %v1276_v10, 8388608.0 }
  0xbf   : > { %v290_v40 = vmul.f32 %v1536_v31, %v286_v37  ;;  %v1263_v41 = vcvt.s32.f32 %v1262_v38  ;;  %vm1261_vm1 = vcmp.lt.f32.partialorder %v1260_v49, 8388608.0 }
  0xc0   : > { %v296_v42 = vmul.f32 127.0, %v292_v39  ;;  %v1280_v7 = vand.u32 2147483647, %v1279_v1 }
  0xc1   : > { %v294_v44 = vmul.f32 127.0, %v290_v40  ;;  %v1264_v45 = vand.u32 2147483647, %v1263_v41 }
  0xc2   : > { %v300_v46 = vmul.f32 %v296_v42, %v255_v4  ;;  %v1282_v12 = vor.u32 %v1281_v8, %v1280_v7 }
  0xc3   : > { %v298_v47 = vmul.f32 %v294_v44, %v253_v5  ;;  %v1266_v51 = vor.u32 %v1265_v48, %v1264_v45 }
  0xc4   : > { %v1286_v54 = vcvt.f32.s32 %v300_v46  ;;  %v1289_v4 = vand.u32 2147483648, %v300_v46  ;;  %v1284_v6 = vand.u32 2147483647, %v300_v46  ;;  %v1283_v14 = vsel %vm1277_vm4, %v1282_v12, %v299_v50 }
  0xc5   : > { %v1270_v52 = vcvt.f32.s32 %v298_v47  ;;  %v1268_v55 = vand.u32 2147483647, %v298_v47  ;;  %v1267_v56 = vsel %vm1261_vm1, %v1266_v51, %v297_v33  ;;  %v1273_v58 = vand.u32 2147483648, %v298_v47 }
  0xc6   : > { %v1287_v61 = vcvt.s32.f32 %v1286_v54  ;;  %v305_v62 = vmax.f32 %v1267_v56, -128.0  ;;  %vm1285_vm3 = vcmp.lt.f32.partialorder %v1284_v6, 8388608.0  ;;  %v307_v18 = vmax.f32 %v1283_v14, -128.0 }
  0xc7   : > { %v1271_v53 = vcvt.s32.f32 %v1270_v52  ;;  %vm1269_vm2 = vcmp.lt.f32.partialorder %v1268_v55, 8388608.0  ;;  %vm626_vm1 = vcmask 130048   ;;  %vm1008_vm4 = vcmask 261312  }
  0xc8   : > { %v1288_v3 = vand.u32 2147483647, %v1287_v61  ;;  %v309_v0 = vmin.f32 %v305_v62, 127.0  ;;  %v311_v20 = vmin.f32 %v307_v18, 127.0 }
  0xc9   : > { %v1272_v57 = vand.u32 2147483647, %v1271_v53 }
  0xca   : > { %v1290_v11 = vor.u32 %v1289_v4, %v1288_v3 }
  0xcb   : > { %v1274_v60 = vor.u32 %v1273_v58, %v1272_v57 }
  0xcc   : > { %v1291_v13 = vsel %vm1285_vm3, %v1290_v11, %v300_v46  ;;  %vm882_vm3 = vcmask 261248  }
  0xcd   : > { %v1275_v63 = vsel %vm1269_vm2, %v1274_v60, %v298_v47  ;;  %v308_v15 = vmax.f32 %v1291_v13, -128.0  ;;  %vm756_vm2 = vcmask 195648  }
  0xce   : > { %v306_v2 = vmax.f32 %v1275_v63, -128.0 }
  0xcf   : > { %v312_v19 = vmin.f32 %v308_v15, 127.0 }
  0xd0   : > { %v310_v5 = vmin.f32 %v306_v2, 127.0 }
  0xd1   : > { %v318_v23 = vpack.c.bf16 %v312_v19, %v311_v20 }
  0xd2   : > { %v317_v9 = vpack.c.bf16 %v310_v5, %v309_v0 }
  0xd4   : > { %1226 = vmatmul.msk.bf16.vlgmr.msra.gmra.mxu0 %vm260_vm0, %v317_v9 }
  0xe4   : > { %1227 = vmatmul.msk.bf16.gmra.mxu0 %vm260_vm0, %v318_v23 }
 0x151   : > { %v350_v26 = vpop.f32.mrf.mxu0 }
 0x152   : > { %v360_v27 = vmul.f32 %v350_v26, %v313_v24 }
 0x154   : > { %v1933_v28 = vmul.f32 %v1528_v25, %v360_v27 }
 0x156   : > { %436 = vrot.lane.b32.xlu2 %v1933_v28, %s1765_s30  ;;  %v372_v40 = vand.u32 2147483647, %v1933_v28 }
 0x158   : > { %v376_v41 = vsel %vm260_vm0, %v372_v40, -inf  ;;  %v521_v46 = vsel %vm520_vm5, %v372_v40, -inf }
 0x159   : > { %v352_v30 = vpop.f32.mrf.mxu0 }
 0x15a   : > { %v361_v31 = vmul.f32 %v352_v30, %v314_v29 }
 0x15c   : > { %v1937_v32 = vmul.f32 %v1528_v25, %v361_v31 }
 0x15e   : > { %438 = vrot.lane.b32.xlu2 %v1937_v32, %s1765_s30  ;;  %v373_v42 = vand.u32 2147483647, %v1937_v32 }
 0x160   : > { %v379_v44 = vsel %vm260_vm0, %v373_v42, -inf  ;;  %v524_v45 = vsel %vm520_vm5, %v373_v42, -inf }
 0x161   : > { %v355_v33 = vpop.f32.mrf.mxu0 }
 0x162   : > { %v362_v34 = vmul.f32 %v355_v33, %v315_v17 }
 0x164   : > { %v1941_v35 = vmul.f32 %v1528_v25, %v362_v34 }
 0x166   : > { %440 = vrot.lane.b32.xlu0 %v1941_v35, %s1765_s30  ;;  %v374_v21 = vand.u32 2147483647, %v1941_v35 }
 0x168   : > { %v382_v43 = vsel %vm260_vm0, %v374_v21, -inf  ;;  %v527_v47 = vsel %vm520_vm5, %v374_v21, -inf }
 0x169   : > { %v357_v37 = vpop.f32.mrf.mxu0 }
 0x16a   : > { %v363_v38 = vmul.f32 %v357_v37, %v316_v36 }
 0x16c   : > { %v1945_v39 = vmul.f32 %v1528_v25, %v363_v38 }
 0x16e   : > { %442 = vrot.lane.b32.xlu1 %v1945_v39, %s1765_s30  ;;  %v375_v22 = vand.u32 2147483647, %v1945_v39  ;;  %s1707_s30 = scalar_lea.hbm %s2207_s4, 64 }
 0x16f   : > { %p1709_p2 = scmp.lt.s32.totalorder %s1707_s30, %s1703_s9 }
 0x170   : > { %v1951_v16 = vsel %vm520_vm5, %v375_v22, -inf  ;;  %v385_v33 = vsel %vm260_vm0, %v375_v22, -inf }
 0x171   : > { %p1710_p9 = por %p1709_p2, %p1708_p11 }
 0x173   : > { %p1711_p10 = pnand %p1710_p9, %p1706_p8 }
 0x190   : > { %377 = vmax.xlane.f32.xlu0 %v376_v41 }
 0x198   : > { %383 = vmax.xlane.f32.xlu0 %v382_v43  ;;  %380 = vmax.xlane.f32.xlu1 %v379_v44 }
 0x1a0   : > { %525 = vmax.xlane.f32.xlu1 %v524_v45 }
 0x1a8   : > { %522 = vmax.xlane.f32.xlu1 %v521_v46 }
 0x1b0   : > { %v437_v48 = vpop.permute.xlu2 %436  ;;  %528 = vmax.xlane.f32.xlu1 %v527_v47 }
 0x1b1   : > { %448 = vxpose.xlu2.b32.start [1/4] (short) (narrow) %v437_v48, 32 }
 0x1b8   : > { %v439_v49 = vpop.permute.xlu2 %438 }
 0x1b9   : > { %449 = vxpose.xlu2.b32.cont [2/4] (short) (narrow) %v439_v49, 32 }
 0x1d8   : > { %v441_v50 = vpop.permute.xlu0 %440 }
 0x1d9   : > { %450 = vxpose.xlu2.b32.cont [3/4] (short) (narrow) %v441_v50, 32 }
 0x1e0   : > { %v443_v51 = vpop.permute.xlu1 %442 }
 0x1e1   : > { %451 = vxpose.xlu2.b32.end [4/4] (short) (narrow) %v443_v51, 32 }
 0x203   : > { %v378_v37 = vpop.xlane.xlu0 %377 }
 0x204   : > { %v1970_v40 = vmax.f32 %v378_v37, 1e-05 }
 0x20b   : > { %v381_v52 = vpop.xlane.xlu1 %380 }
 0x20c   : > { %v1973_v43 = vmax.f32 %v381_v52, 1e-05 }
 0x213   : > { %v526_v53 = vpop.xlane.xlu1 %525 }
 0x214   : > { %v534_v54 = vmax.f32 %v526_v53, 1e-05 }
 0x216   : > { %1537 = vrcp.f32 %v534_v54  ;;  %v574_v26 = vmul.f32 0.007874016, %v534_v54 }
 0x21b   : > { %v523_v55 = vpop.xlane.xlu1 %522 }
 0x21c   : > { %v1538_v56 = vpop.eup %1537  ;;  %v533_v57 = vmax.f32 %v523_v55, 1e-05 }
 0x21d   : > { %v542_v58 = vmul.f32 %v1538_v56, %v534_v54 }
 0x21e   : > { %1539 = vrcp.f32 %v533_v57  ;;  %v573_v27 = vmul.f32 0.007874016, %v533_v57 }
 0x21f   : > { %v546_v59 = vsub.f32 2.0, %v542_v58  ;;  %1541 = vrcp.f32 %v1970_v40 }
 0x220   : > { %1543 = vrcp.f32 %v1973_v43 }
 0x221   : > { %v550_v60 = vmul.f32 %v1538_v56, %v546_v59 }
 0x223   : > { %v554_v61 = vmul.f32 127.0, %v550_v60 }
 0x224   : > { %v1540_v62 = vpop.eup %1539 }
 0x225   : > { %v558_v63 = vmul.f32 %v554_v61, %v1937_v32  ;;  %v541_v1 = vmul.f32 %v1540_v62, %v533_v57  ;;  %v1542_v51 = vpop.eup %1541 }
 0x226   : > { %v396_v54 = vmul.f32 %v1542_v51, %v1970_v40  ;;  %v1544_v55 = vpop.eup %1543 }
 0x227   : > { %v545_v2 = vsub.f32 2.0, %v541_v1  ;;  %v1366_v3 = vcvt.f32.s32 %v558_v63  ;;  %v1369_v7 = vand.u32 2147483648, %v558_v63  ;;  %v1364_v8 = vand.u32 2147483647, %v558_v63 }
 0x228   : > { %v400_v57 = vsub.f32 2.0, %v396_v54  ;;  %v397_v58 = vmul.f32 %v1544_v55, %v1973_v43 }
 0x229   : > { %v549_v4 = vmul.f32 %v1540_v62, %v545_v2  ;;  %v1367_v0 = vcvt.s32.f32 %v1366_v3  ;;  %vm1365_vm6 = vcmp.lt.f32.partialorder %v1364_v8, 8388608.0 }
 0x22a   : > { %v404_v61 = vmul.f32 %v1542_v51, %v400_v57  ;;  %v401_v62 = vsub.f32 2.0, %v397_v58 }
 0x22b   : > { %v553_v5 = vmul.f32 127.0, %v549_v4  ;;  %v1368_v6 = vand.u32 2147483647, %v1367_v0 }
 0x22c   : > { %v408_v2 = vmul.f32 127.0, %v404_v61  ;;  %v405_v3 = vmul.f32 %v1544_v55, %v401_v62 }
 0x22d   : > { %v557_v9 = vmul.f32 %v553_v5, %v1933_v28  ;;  %v1370_v10 = vor.u32 %v1369_v7, %v1368_v6 }
 0x22e   : > { %v1986_v0 = vmul.f32 %v408_v2, %v1933_v28  ;;  %v409_v5 = vmul.f32 127.0, %v405_v3 }
 0x22f   : > { %v1358_v11 = vcvt.f32.s32 %v557_v9  ;;  %v1371_v13 = vsel %vm1365_vm6, %v1370_v10, %v558_v63  ;;  %v1356_v14 = vand.u32 2147483647, %v557_v9  ;;  %v1361_v18 = vand.u32 2147483648, %v557_v9 }
 0x230   : > { %v566_v19 = vmax.f32 %v1371_v13, -128.0  ;;  %v1989_v7 = vmul.f32 %v409_v5, %v1937_v32  ;;  %v1294_v8 = vcvt.f32.s32 %v1986_v0  ;;  %vm1019_vm6 = vcmask 64512  }
 0x231   : > { %v1359_v12 = vcvt.s32.f32 %v1358_v11  ;;  %vm1357_vm7 = vcmp.lt.f32.partialorder %v1356_v14, 8388608.0 }
 0x232   : > { %v570_v25 = vmin.f32 %v566_v19, 127.0  ;;  %v1295_v11 = vcvt.s32.f32 %v1294_v8 }
 0x233   : > { %v1360_v15 = vand.u32 2147483647, %v1359_v12  ;;  %v1302_v12 = vcvt.f32.s32 %v1989_v7 }
 0x234   : > { %v1963_v31 = vmul.f32 %v574_v26, %v570_v25  ;;  %v1292_v26 = vand.u32 2147483647, %v1986_v0 }
 0x235   : > { %v1362_v20 = vor.u32 %v1361_v18, %v1360_v15  ;;  %v1296_v15 = vand.u32 2147483647, %v1295_v11  ;;  %v1303_v18 = vcvt.s32.f32 %v1302_v12 }
 0x236   : > { %vm1293_vm12 = vcmp.lt.f32.partialorder %v1292_v26, 8388608.0 }
 0x237   : > { %v1363_v23 = vsel %vm1357_vm7, %v1362_v20, %v557_v9  ;;  %v1304_v37 = vand.u32 2147483647, %v1303_v18 }
 0x238   : > { %v565_v24 = vmax.f32 %v1363_v23, -128.0  ;;  %v1297_v23 = vand.u32 2147483648, %v1986_v0 }
 0x23a   : > { %v569_v29 = vmin.f32 %v565_v24, 127.0 }
 0x23c   : > { %v1961_v30 = vmul.f32 %v573_v27, %v569_v29  ;;  %v1298_v29 = vor.u32 %v1297_v23, %v1296_v15 }
 0x23e   : > { %v1523_v17 = vpack.i.bf16 %v1961_v30, %v1963_v31  ;;  %v1299_v11 = vsel %vm1293_vm12, %v1298_v29, %v1986_v0 }
 0x252   : > { %386 = vmax.xlane.f32.xlu2 %v385_v33  ;;  %v1300_v33 = vand.u32 2147483647, %v1989_v7 }
 0x254   : > { %vm1998_vm8 = vcmp.lt.f32.partialorder %v1300_v33, 8388608.0 }
 0x262   : > { %v464_v34 = vpop.trf.xlu2 }
 0x263   : > { %v480_v41 = vand.u32 2147483647, %v464_v34 }
 0x265   : > { %v484_v44 = vsel %vm260_vm0, %v480_v41, -inf }
 0x26a   : > { %v465_v36 = vpop.trf.xlu2 }
 0x26b   : > { %v481_v21 = vand.u32 2147483647, %v465_v36 }
 0x26d   : > { %v485_v45 = vsel %vm260_vm0, %v481_v21, -inf }
 0x26e   : > { %v488_v48 = vmax.f32 %v484_v44, %v485_v45  ;;  %v1305_v44 = vand.u32 2147483648, %v1989_v7 }
 0x272   : > { %v466_v38 = vpop.trf.xlu2 }
 0x273   : > { %v482_v42 = vand.u32 2147483647, %v466_v38 }
 0x275   : > { %v486_v22 = vsel %vm260_vm0, %v482_v42, -inf }
 0x27a   : > { %v467_v46 = vpop.trf.xlu2 }
 0x27b   : > { %v483_v47 = vand.u32 2147483647, %v467_v46 }
 0x27d   : > { %v487_v49 = vsel %vm260_vm0, %v483_v47, -inf }
 0x27e   : > { %v489_v50 = vmax.f32 %v486_v22, %v487_v49 }
 0x280   : > { %v490_v53 = vmax.f32 %v488_v48, %v489_v50 }
 0x282   : > { %v491_v52 = vrot.slane %v490_v53, 4 }
 0x284   : > { %v492_v56 = vmax.f32 %v490_v53, %v491_v52  ;;  %v1306_v53 = vor.u32 %v1305_v44, %v1304_v37 }
 0x286   : > { %v493_v59 = vrot.slane %v492_v56, 2  ;;  %v1307_v3 = vsel %vm1998_vm8, %v1306_v53, %v1989_v7 }
 0x288   : > { %v494_v60 = vmax.f32 %v492_v56, %v493_v59  ;;  %v384_v56 = vpop.xlane.xlu0 %383 }
 0x289   : > { %v2005_v5 = vmax.f32 %v384_v56, 1e-05 }
 0x28a   : > { %v495_v63 = vrot.slane %v494_v60, 1 }
 0x28c   : > { %v496_v1 = vmax.f32 %v494_v60, %v495_v63 }
 0x28e   : > { %v1982_v4 = vmax.f32 %v496_v1, 1e-05 }
 0x290   : > { %1545 = vrcp.f32 %v1982_v4 }
 0x291   : > { %1547 = vrcp.f32 %v2005_v5 }
 0x296   : > { %v1546_v6 = vpop.eup %1545 }
 0x297   : > { %v499_v9 = vmul.f32 %v1546_v6, %v1982_v4 }
 0x299   : > { %v500_v10 = vsub.f32 2.0, %v499_v9 }
 0x29b   : > { %v501_v13 = vmul.f32 %v1546_v6, %v500_v10 }
 0x29d   : > { %v502_v14 = vmul.f32 127.0, %v501_v13  ;;  %v421_v13 = vmax.f32 %v1307_v3, -128.0  ;;  %v519_v3 = vmul.f32 0.007874016, %v1982_v4 }
 0x29f   : > { %v506_v19 = vmul.f32 %v502_v14, %v467_v46  ;;  %v505_v28 = vmul.f32 %v502_v14, %v466_v38  ;;  %v503_v20 = vmul.f32 %v502_v14, %v464_v34  ;;  %v504_v25 = vmul.f32 %v502_v14, %v465_v36 }
 0x2a1   : > { %v1350_v24 = vcvt.f32.s32 %v506_v19  ;;  %v1342_v32 = vcvt.f32.s32 %v505_v28  ;;  %v1326_v27 = vcvt.f32.s32 %v503_v20  ;;  %v1340_v41 = vand.u32 2147483647, %v505_v28 }
 0x2a2   : > { %v1345_v45 = vand.u32 2147483648, %v505_v28  ;;  %v1348_v38 = vand.u32 2147483647, %v506_v19  ;;  %v1324_v34 = vand.u32 2147483647, %v503_v20  ;;  %v1353_v48 = vand.u32 2147483648, %v506_v19 }
 0x2a3   : > { %v1343_v21 = vcvt.s32.f32 %v1342_v32  ;;  %v1351_v42 = vcvt.s32.f32 %v1350_v24  ;;  %v1327_v46 = vcvt.s32.f32 %v1326_v27  ;;  %v1334_v36 = vcvt.f32.s32 %v504_v25  ;;  %v1548_v32 = vpop.eup %1547 }
 0x2a4   : > { %v1329_v50 = vand.u32 2147483648, %v503_v20  ;;  %vm1341_vm9 = vcmp.lt.f32.partialorder %v1340_v41, 8388608.0  ;;  %vm1349_vm10 = vcmp.lt.f32.partialorder %v1348_v38, 8388608.0  ;;  %vm1325_vm11 = vcmp.lt.f32.partialorder %v1324_v34, 8388608.0 }
 0x2a5   : > { %v1344_v22 = vand.u32 2147483647, %v1343_v21  ;;  %v1352_v47 = vand.u32 2147483647, %v1351_v42  ;;  %v1328_v49 = vand.u32 2147483647, %v1327_v46  ;;  %v1335_v55 = vcvt.s32.f32 %v1334_v36 }
 0x2a6   : > { %v1332_v58 = vand.u32 2147483647, %v504_v25  ;;  %v1337_v62 = vand.u32 2147483648, %v504_v25  ;;  %v398_v0 = vmul.f32 %v1548_v32, %v2005_v5 }
 0x2a7   : > { %v1346_v54 = vor.u32 %v1345_v45, %v1344_v22  ;;  %v1354_v52 = vor.u32 %v1353_v48, %v1352_v47  ;;  %v1330_v57 = vor.u32 %v1329_v50, %v1328_v49  ;;  %v1336_v61 = vand.u32 2147483647, %v1335_v55 }
 0x2a8   : > { %vm1333_vm13 = vcmp.lt.f32.partialorder %v1332_v58, 8388608.0 }
 0x2a9   : > { %v1347_v59 = vsel %vm1341_vm9, %v1346_v54, %v505_v28  ;;  %v1355_v60 = vsel %vm1349_vm10, %v1354_v52, %v506_v19  ;;  %v1331_v2 = vsel %vm1325_vm11, %v1330_v57, %v503_v20  ;;  %v1338_v6 = vor.u32 %v1337_v62, %v1336_v61 }
 0x2aa   : > { %v513_v63 = vmax.f32 %v1347_v59, -128.0  ;;  %v514_v1 = vmax.f32 %v1355_v60, -128.0  ;;  %v511_v8 = vmax.f32 %v1331_v2, -128.0  ;;  %v420_v19 = vmax.f32 %v1299_v11, -128.0 }
 0x2ab   : > { %v1339_v12 = vsel %vm1333_vm13, %v1338_v6, %v504_v25  ;;  %v425_v28 = vmin.f32 %v421_v13, 127.0  ;;  %v402_v25 = vsub.f32 2.0, %v398_v0  ;;  %v428_v62 = vmul.f32 0.007874016, %v1970_v40 }
 0x2ac   : > { %v517_v9 = vmin.f32 %v513_v63, 127.0  ;;  %v518_v10 = vmin.f32 %v514_v1, 127.0  ;;  %v512_v15 = vmax.f32 %v1339_v12, -128.0  ;;  %v515_v18 = vmin.f32 %v511_v8, 127.0 }
 0x2ad   : > { %v424_v23 = vmin.f32 %v420_v19, 127.0  ;;  %v406_v26 = vmul.f32 %v1548_v32, %v402_v25  ;;  %v610_v63 = vmul.f32 0.17677669, %v428_v62  ;;  %v429_v8 = vmul.f32 0.007874016, %v1973_v43 }
 0x2ae   : > { %v584_v14 = vpack.c.bf16 %v518_v10, %v517_v9  ;;  %v516_v7 = vmin.f32 %v512_v15, 127.0 }
 0x2af   : > { %v581_v24 = vpack.c.bf16 %v425_v28, %v424_v23  ;;  %v410_v27 = vmul.f32 127.0, %v406_v26  ;;  %v611_v10 = vmul.f32 0.17677669, %v429_v8 }
 0x2b0   : > { %597 = vmatpush.bf16.msra.mxu1 %v584_v14  ;;  %v583_v20 = vpack.c.bf16 %v516_v7, %v515_v18  ;;  %v430_v14 = vmul.f32 0.007874016, %v2005_v5  ;;  %v529_v5 = vpop.xlane.xlu1 %528 }
 0x2b1   : > { %v414_v37 = vmul.f32 %v410_v27, %v1941_v35 }
 0x2b2   : > { %v612_v43 = vmul.f32 0.17677669, %v430_v14 }
 0x2b3   : > { %v1310_v41 = vcvt.f32.s32 %v414_v37  ;;  %v1313_v47 = vand.u32 2147483648, %v414_v37  ;;  %v1308_v48 = vand.u32 2147483647, %v414_v37 }
 0x2b4   : > { %598 = vmatpush.bf16.msra.mxu1 %v583_v20 }
 0x2b5   : > { %v1311_v45 = vcvt.s32.f32 %v1310_v41  ;;  %vm1309_vm14 = vcmp.lt.f32.partialorder %v1308_v48, 8388608.0 }
 0x2b7   : > { %1228 = vmatmul.msk.bf16.vlgmr.msra.gmra.mxu1 %vm260_vm0, %v581_v24  ;;  %v1312_v46 = vand.u32 2147483647, %v1311_v45 }
 0x2b9   : > { %v1314_v36 = vor.u32 %v1313_v47, %v1312_v46 }
 0x2bb   : > { %v1315_v53 = vsel %vm1309_vm14, %v1314_v36, %v414_v37 }
 0x2bc   : > { %v422_v56 = vmax.f32 %v1315_v53, -128.0 }
 0x2be   : > { %v426_v59 = vmin.f32 %v422_v56, 127.0 }
 0x2c5   : > { %v387_v29 = vpop.xlane.xlu2 %386 }
 0x2c6   : > { %v391_v33 = vmax.f32 %v387_v29, 1e-05 }
 0x2c8   : > { %1549 = vrcp.f32 %v391_v33  ;;  %v431_v7 = vmul.f32 0.007874016, %v391_v33 }
 0x2ca   : > { %v613_v23 = vmul.f32 0.17677669, %v431_v7 }
 0x2ce   : > { %v1550_v21 = vpop.eup %1549 }
 0x2cf   : > { %v399_v42 = vmul.f32 %v1550_v21, %v391_v33 }
 0x2d1   : > { %v403_v44 = vsub.f32 2.0, %v399_v42 }
 0x2d3   : > { %v407_v38 = vmul.f32 %v1550_v21, %v403_v44 }
 0x2d5   : > { %v411_v34 = vmul.f32 127.0, %v407_v38 }
 0x2d7   : > { %v415_v22 = vmul.f32 %v411_v34, %v1945_v39 }
 0x2d9   : > { %v1318_v49 = vcvt.f32.s32 %v415_v22  ;;  %v1316_v51 = vand.u32 2147483647, %v415_v22  ;;  %v1321_v52 = vand.u32 2147483648, %v415_v22 }
 0x2db   : > { %v1319_v50 = vcvt.s32.f32 %v1318_v49  ;;  %vm1317_vm15 = vcmp.lt.f32.partialorder %v1316_v51, 8388608.0 }
 0x2dd   : > { %v1320_v54 = vand.u32 2147483647, %v1319_v50 }
 0x2df   : > { %v1322_v55 = vor.u32 %v1321_v52, %v1320_v54 }
 0x2e1   : > { %v1323_v57 = vsel %vm1317_vm15, %v1322_v55, %v415_v22  ;;  %v535_v55 = vmax.f32 %v529_v5, 1e-05 }
 0x2e2   : > { %v423_v58 = vmax.f32 %v1323_v57, -128.0 }
 0x2e4   : > { %v427_v60 = vmin.f32 %v423_v58, 127.0 }
 0x2e6   : > { %v582_v61 = vpack.c.bf16 %v427_v60, %v426_v59 }
 0x2e8   : > { %1229 = vmatmul.msk.bf16.gmra.mxu1 %vm260_vm0, %v582_v61 }
 0x334   : > { %v600_v1 = vpop.f32.mrf.mxu1 }
 0x335   : > { %v614_v2 = vmul.f32 %v610_v63, %v600_v1 }
 0x337   : > { %v2016_v6 = vmul.f32 %v614_v2, %v519_v3 }
 0x339   : > { %v627_v9 = vsel %vm626_vm1, %v2016_v6, -inf }
 0x33a   : > { %628 = vmax.xlane.f32.xlu1 %v627_v9 }
 0x33c   : > { %v602_v11 = vpop.f32.mrf.mxu1 }
 0x33d   : > { %v615_v12 = vmul.f32 %v611_v10, %v602_v11 }
 0x33f   : > { %v2021_v13 = vmul.f32 %v615_v12, %v519_v3 }
 0x341   : > { %v757_v40 = vsel %vm756_vm2, %v2021_v13, -inf  ;;  %v630_v4 = vsel %vm626_vm1, %v2021_v13, -inf }
 0x342   : > { %758 = vmax.xlane.f32.xlu1 %v757_v40  ;;  %631 = vmax.xlane.f32.xlu0 %v630_v4 }
 0x365   : > { %v605_v15 = vpop.f32.mrf.mxu1 }
 0x366   : > { %v616_v18 = vmul.f32 %v612_v43, %v605_v15 }
 0x368   : > { %v620_v19 = vmul.f32 %v616_v18, %v519_v3 }
 0x36a   : > { %v883_v28 = vsel %vm882_vm3, %v620_v19, -inf  ;;  %v760_v20 = vsel %vm756_vm2, %v620_v19, -inf }
 0x36b   : > { %884 = vmax.xlane.f32.xlu1 %v883_v28  ;;  %761 = vmax.xlane.f32.xlu0 %v760_v20 }
 0x36d   : > { %v607_v24 = vpop.f32.mrf.mxu1 }
 0x36e   : > { %v617_v32 = vmul.f32 %v613_v23, %v607_v24 }
 0x370   : > { %v621_v0 = vmul.f32 %v617_v32, %v519_v3 }
 0x372   : > { %v1009_v25 = vsel %vm1008_vm4, %v621_v0, -inf  ;;  %v886_v26 = vsel %vm882_vm3, %v621_v0, -inf }
 0x373   : > { %1010 = vmax.xlane.f32.xlu1 %v1009_v25  ;;  %887 = vmax.xlane.f32.xlu0 %v886_v26 }
 0x3ad   : > { %v629_v27 = vpop.xlane.xlu1 %628 }
 0x3ae   : > { %v633_v57 = vsub.f32 %v2016_v6, %v629_v27 }
 0x3b0   : > { %v635_v59 = vmul.f32 1.442695, %v633_v57 }
 0x3b5   : > { %v759_v29 = vpop.xlane.xlu1 %758  ;;  %v632_v21 = vpop.xlane.xlu0 %631 }
 0x3b6   : > { %v763_v37 = vsub.f32 %v2021_v13, %v759_v29  ;;  %v634_v61 = vsub.f32 %v2021_v13, %v632_v21 }
 0x3b8   : > { %v765_v41 = vmul.f32 1.442695, %v763_v37  ;;  %v637_v63 = vmul.f32 1.442695, %v634_v61 }
 0x3ba   : > { %1551 = vpow2.f32 %v765_v41 }
 0x3c0   : > { %v2028_v33 = vpop.eup %1551 }
 0x3c1   : > { %771 = vrot.lane.b32.xlu0 %v2028_v33, %s1766_s5 }
 0x3de   : > { %v762_v42 = vpop.xlane.xlu0 %761  ;;  %v885_v44 = vpop.xlane.xlu1 %884 }
 0x3df   : > { %v764_v45 = vsub.f32 %v620_v19, %v762_v42  ;;  %v889_v34 = vsub.f32 %v620_v19, %v885_v44  ;;  %v575_v19 = vmul.f32 0.007874016, %v535_v55 }
 0x3e1   : > { %v767_v38 = vmul.f32 1.442695, %v764_v45  ;;  %v891_v22 = vmul.f32 1.442695, %v889_v34 }
 0x3e3   : > { %1553 = vpow2.f32 %v767_v38 }
 0x3e4   : > { %1555 = vpow2.f32 %v891_v22 }
 0x3e6   : > { %v888_v46 = vpop.xlane.xlu0 %887  ;;  %v1011_v48 = vpop.xlane.xlu1 %1010 }
 0x3e7   : > { %v890_v47 = vsub.f32 %v621_v0, %v888_v46  ;;  %v1012_v50 = vsub.f32 %v621_v0, %v1011_v48 }
 0x3e9   : > { %v893_v36 = vmul.f32 1.442695, %v890_v47  ;;  %v2032_v49 = vpop.eup %1553  ;;  %v1013_v51 = vmul.f32 1.442695, %v1012_v50 }
 0x3ea   : > { %773 = vrot.lane.b32.xlu0 %v2032_v49, %s1766_s5  ;;  %v2036_v53 = vpop.eup %1555 }
 0x3eb   : > { %1557 = vpow2.f32 %v893_v36 }
 0x3ec   : > { %1559 = vpow2.f32 %v1013_v51 }
 0x3ed   : > { %1561 = vrcp.f32 %v535_v55 }
 0x3ee   : > { %1563 = vpow2.f32 %v635_v59 }
 0x3ef   : > { %1565 = vpow2.f32 %v637_v63 }
 0x3f1   : > { %v2038_v54 = vpop.eup %1557 }
 0x3f2   : > { %897 = vrot.lane.b32.xlu0 %v2036_v53, %s1767_s6  ;;  %899 = vrot.lane.b32.xlu1 %v2038_v54, %s1767_s6  ;;  %v2044_v52 = vpop.eup %1559 }
 0x3f3   : > { %v1562_v56 = vpop.eup %1561 }
 0x3f4   : > { %v543_v58 = vmul.f32 %v1562_v56, %v535_v55  ;;  %v2050_v1 = vpop.eup %1563 }
 0x3f5   : > { %v639_v3 = vsel %vm626_vm1, %v2050_v1, 0.0  ;;  %v2055_v9 = vpop.eup %1565 }
 0x3f6   : > { %v547_v60 = vsub.f32 2.0, %v543_v58  ;;  %v642_v10 = vsel %vm626_vm1, %v2055_v9, 0.0 }
 0x3f8   : > { %v551_v62 = vmul.f32 %v1562_v56, %v547_v60 }
 0x3fa   : > { %1016 = vrot.lane.b32.xlu1 %v2044_v52, %s1768_s7  ;;  %v555_v2 = vmul.f32 127.0, %v551_v62 }
 0x3fc   : > { %v559_v8 = vmul.f32 %v555_v2, %v1941_v35 }
 0x3fe   : > { %v1374_v6 = vcvt.f32.s32 %v559_v8  ;;  %v1377_v13 = vand.u32 2147483648, %v559_v8  ;;  %v1372_v40 = vand.u32 2147483647, %v559_v8 }
 0x400   : > { %v1375_v11 = vcvt.s32.f32 %v1374_v6  ;;  %vm1373_vm5 = vcmp.lt.f32.partialorder %v1372_v40, 8388608.0 }
 0x402   : > { %v1376_v12 = vand.u32 2147483647, %v1375_v11 }
 0x404   : > { %v1378_v4 = vor.u32 %v1377_v13, %v1376_v12 }
 0x406   : > { %v1379_v14 = vsel %vm1373_vm5, %v1378_v4, %v559_v8 }
 0x407   : > { %v567_v15 = vmax.f32 %v1379_v14, -128.0 }
 0x409   : > { %v571_v18 = vmin.f32 %v567_v15, 127.0 }
 0x40b   : > { %v579_v7 = vmul.f32 %v575_v19, %v571_v18 }
 0x41c   : > { %640 = vadd.xlane.f32.xlu0 %v639_v3 }
 0x424   : > { %643 = vadd.xlane.f32.xlu0 %v642_v10  ;;  %531 = vmax.xlane.f32.xlu1 %v1951_v16 }
 0x433   : > { %v772_v43 = vpop.permute.xlu0 %771 }
 0x434   : > { %v777_v35 = vsel %vm626_vm1, %v772_v43, 0.0 }
 0x435   : > { %778 = vadd.xlane.f32.xlu0 %v777_v35 }
 0x43d   : > { %800 = vrot.lane.b32.xlu1 %v579_v7, %s1769_s11 }
 0x45c   : > { %v774_v28 = vpop.permute.xlu0 %773 }
 0x45d   : > { %v780_v16 = vsel %vm626_vm1, %v774_v28, 0.0 }
 0x45e   : > { %781 = vadd.xlane.f32.xlu0 %v780_v16 }
 0x464   : > { %v898_v20 = vpop.permute.xlu0 %897  ;;  %v900_v24 = vpop.permute.xlu1 %899 }
 0x465   : > { %v903_v23 = vsel %vm626_vm1, %v898_v20, 0.0  ;;  %v906_v32 = vsel %vm626_vm1, %v900_v24, 0.0 }
 0x466   : > { %904 = vadd.xlane.f32.xlu2 %v903_v23 }
 0x46c   : > { %v1017_v0 = vpop.permute.xlu1 %1016 }
 0x46d   : > { %v1020_v25 = vsel %vm1019_vm6, %v1017_v0, 0.0 }
 0x46e   : > { %907 = vadd.xlane.f32.xlu2 %v906_v32 }
 0x472   : > { %1524 = vrot.lane.b32.xlu0 %v1523_v17, %s1769_s11 }
 0x476   : > { %1021 = vadd.xlane.f32.xlu2 %v1020_v25 }
 0x48f   : > { %v641_v26 = vpop.xlane.xlu0 %640 }
 0x497   : > { %v532_v5 = vpop.xlane.xlu1 %531  ;;  %v644_v37 = vpop.xlane.xlu0 %643 }
 0x498   : > { %v536_v27 = vmax.f32 %v532_v5, 1e-05 }
 0x49a   : > { %1567 = vrcp.f32 %v536_v27  ;;  %v576_v56 = vmul.f32 0.007874016, %v536_v27 }
 0x4a0   : > { %v1568_v29 = vpop.eup %1567 }
 0x4a1   : > { %v544_v41 = vmul.f32 %v1568_v29, %v536_v27 }
 0x4a3   : > { %v548_v21 = vsub.f32 2.0, %v544_v41 }
 0x4a5   : > { %v552_v42 = vmul.f32 %v1568_v29, %v548_v21 }
 0x4a7   : > { %v556_v44 = vmul.f32 127.0, %v552_v42 }
 0x4a8   : > { %v779_v45 = vpop.xlane.xlu0 %778 }
 0x4a9   : > { %v560_v38 = vmul.f32 %v556_v44, %v1945_v39  ;;  %1569 = vrcp.f32 %v779_v45 }
 0x4ab   : > { %v1382_v30 = vcvt.f32.s32 %v560_v38  ;;  %v1380_v17 = vand.u32 2147483647, %v560_v38  ;;  %v1385_v22 = vand.u32 2147483648, %v560_v38 }
 0x4ad   : > { %v1383_v31 = vcvt.s32.f32 %v1382_v30  ;;  %vm1381_vm7 = vcmp.lt.f32.partialorder %v1380_v17, 8388608.0 }
 0x4af   : > { %v1570_v34 = vpop.eup %1569  ;;  %v1384_v46 = vand.u32 2147483647, %v1383_v31  ;;  %v801_v23 = vpop.permute.xlu1 %800 }
 0x4b0   : > { %v785_v47 = vmul.f32 %v1570_v34, %v779_v45 }
 0x4b1   : > { %v1386_v48 = vor.u32 %v1385_v22, %v1384_v46 }
 0x4b2   : > { %v787_v36 = vsub.f32 2.0, %v785_v47 }
 0x4b3   : > { %v1387_v50 = vsel %vm1381_vm7, %v1386_v48, %v560_v38 }
 0x4b4   : > { %v789_v51 = vmul.f32 %v1570_v34, %v787_v36  ;;  %v568_v55 = vmax.f32 %v1387_v50, -128.0  ;;  %v1258_v36 = vld [vmem:[#allocation7 + $0x8] sm:$0xff] }
 0x4b5   : > { %744 = vmatpush.bf16.msra.mxu3 %v1258_v36  ;;  %996 = vmatpush.bf16.msrb.mxu0 %v1258_v36 }
 0x4b6   : > { %v791_v57 = vmul.f32 %v2028_v33, %v789_v51  ;;  %v572_v58 = vmin.f32 %v568_v55, 127.0  ;;  %v1257_v55 = vld [vmem:[#allocation7] sm:$0xff] }
 0x4b8   : > { %795 = vrot.lane.b32.xlu2 %v791_v57, %s1766_s5  ;;  %v580_v39 = vmul.f32 %v576_v56, %v572_v58 }
 0x4b9   : > { %745 = vmatpush.bf16.msra.mxu3 %v1257_v55  ;;  %997 = vmatpush.bf16.msrb.mxu0 %v1257_v55 }
 0x4ba   : > { %926 = vrot.lane.b32.xlu1 %v580_v39, %s1769_s11 }
 0x4bd   : > { %870 = vmatpush.bf16.msrb.mxu3 %v1258_v36 }
 0x4c1   : > { %871 = vmatpush.bf16.msrb.mxu3 %v1257_v55 }
 0x4d1   : > { %v782_v59 = vpop.xlane.xlu0 %781 }
 0x4d2   : > { %1571 = vrcp.f32 %v782_v59 }
 0x4d3   : > { %1573 = vrcp.f32 %v641_v26 }
 0x4d8   : > { %v1572_v60 = vpop.eup %1571 }
 0x4d9   : > { %v1574_v61 = vpop.eup %1573  ;;  %v786_v62 = vmul.f32 %v1572_v60, %v782_v59  ;;  %v905_v63 = vpop.xlane.xlu2 %904 }
 0x4da   : > { %1575 = vrcp.f32 %v905_v63  ;;  %v647_v3 = vmul.f32 %v1574_v61, %v641_v26 }
 0x4db   : > { %1577 = vrcp.f32 %v644_v37  ;;  %v788_v2 = vsub.f32 2.0, %v786_v62 }
 0x4dc   : > { %v649_v10 = vsub.f32 2.0, %v647_v3 }
 0x4dd   : > { %v790_v8 = vmul.f32 %v1572_v60, %v788_v2 }
 0x4de   : > { %v651_v4 = vmul.f32 %v1574_v61, %v649_v10 }
 0x4df   : > { %v792_v33 = vmul.f32 %v2032_v49, %v790_v8 }
 0x4e0   : > { %v1576_v6 = vpop.eup %1575  ;;  %v653_v28 = vmul.f32 %v2050_v1, %v651_v4 }
 0x4e1   : > { %v1578_v11 = vpop.eup %1577  ;;  %v911_v12 = vmul.f32 %v1576_v6, %v905_v63  ;;  %v908_v13 = vpop.xlane.xlu2 %907  ;;  %797 = vrot.lane.b32.xlu0 %v792_v33, %s1766_s5 }
 0x4e2   : > { %1579 = vrcp.f32 %v908_v13  ;;  %v648_v14 = vmul.f32 %v1578_v11, %v644_v37 }
 0x4e3   : > { %v913_v40 = vsub.f32 2.0, %v911_v12 }
 0x4e4   : > { %v1525_v43 = vpop.permute.xlu0 %1524  ;;  %v650_v49 = vsub.f32 2.0, %v648_v14 }
 0x4e5   : > { %v915_v15 = vmul.f32 %v1576_v6, %v913_v40  ;;  %v1526_v35 = vunpack.i.l.bf16 %v1525_v43  ;;  %v1527_v19 = vunpack.i.h.bf16 %v1525_v43 }
 0x4e6   : > { %v652_v32 = vmul.f32 %v1578_v11, %v650_v49 }
 0x4e7   : > { %683 = vmatpush.msra.mxu2 %v1526_v35  ;;  %v917_v18 = vmul.f32 %v2036_v53, %v915_v15 }
 0x4e8   : > { %v1580_v7 = vpop.eup %1579  ;;  %v654_v26 = vmul.f32 %v2055_v9, %v652_v32 }
 0x4e9   : > { %v912_v16 = vmul.f32 %v1580_v7, %v908_v13  ;;  %v1022_v20 = vpop.xlane.xlu2 %1021  ;;  %921 = vrot.lane.b32.xlu2 %v917_v18, %s1767_s6  ;;  %684 = vmatpush.msra.mxu2 %v1527_v19 }
 0x4ea   : > { %1581 = vrcp.f32 %v1022_v20  ;;  %1230 = vmatmul.msk.f32.vlgmr.msra.gmra.mxu2 %vm626_vm1, %v653_v28 }
 0x4eb   : > { %v914_v24 = vsub.f32 2.0, %v912_v16  ;;  %821 = vmatpush.msrb.mxu2 %v801_v23 }
 0x4ed   : > { %v916_v0 = vmul.f32 %v1580_v7, %v914_v24  ;;  %822 = vmatpush.msrb.mxu2 %v1526_v35 }
 0x4ef   : > { %v918_v53 = vmul.f32 %v2038_v54, %v916_v0 }
 0x4f0   : > { %v1582_v25 = vpop.eup %1581 }
 0x4f1   : > { %v1024_v1 = vmul.f32 %v1582_v25, %v1022_v20  ;;  %923 = vrot.lane.b32.xlu0 %v918_v53, %s1767_s6 }
 0x4f2   : > { %1231 = vmatmul.msk.f32.gmra.mxu2 %vm626_vm1, %v654_v26 }
 0x4f3   : > { %v1025_v5 = vsub.f32 2.0, %v1024_v1 }
 0x4f5   : > { %v1026_v27 = vmul.f32 %v1582_v25, %v1025_v5 }
 0x4f7   : > { %v1027_v29 = vmul.f32 %v2044_v52, %v1026_v27 }
 0x4f9   : > { %1029 = vrot.lane.b32.xlu1 %v1027_v29, %s1768_s7 }
 0x512   : > { %v796_v37 = vpop.permute.xlu2 %795 }
 0x513   : > { %1241 = vmatmul.msk.f32.vlgmr.msrb.gmra.mxu2 %vm626_vm1, %v796_v37 }
 0x52c   : > { %v927_v41 = vpop.permute.xlu1 %926 }
 0x52d   : > { %947 = vmatpush.msra.mxu2 %v927_v41  ;;  %1048 = vmatpush.msrb.mxu1 %v927_v41 }
 0x52f   : > { %948 = vmatpush.msra.mxu2 %v801_v23 }
 0x543   : > { %v922_v9 = vpop.permute.xlu2 %921 }
 0x553   : > { %v798_v54 = vpop.permute.xlu0 %797 }
 0x554   : > { %1242 = vmatmul.msk.f32.gmra.mxu2 %vm626_vm1, %v798_v54 }
 0x55c   : > { %1244 = vmatmul.msk.f32.vlgmr.msra.gmra.mxu2 %vm626_vm1, %v922_v9 }
 0x563   : > { %v924_v21 = vpop.permute.xlu0 %923 }
 0x564   : > { %1245 = vmatmul.msk.f32.gmra.mxu2 %vm626_vm1, %v924_v21 }
 0x56b   : > { %v1030_v42 = vpop.permute.xlu1 %1029 }
 0x56c   : > { %1247 = vmatmul.msk.f32.vlgmr.msrb.gmra.mxu1 %vm1019_vm6, %v1030_v42 }
 0x56d   : > { %v686_v52 = vpop.f32.mrf.mxu2 }
 0x56e   : > { %v692_v44 = vand.u32 2147483647, %v686_v52 }
 0x570   : > { %v694_v45 = vsel %vm260_vm0, %v692_v44, -inf }
 0x571   : > { %695 = vmax.xlane.f32.xlu2 %v694_v45 }
 0x575   : > { %v689_v38 = vpop.f32.mrf.mxu2 }
 0x576   : > { %v693_v30 = vand.u32 2147483647, %v689_v38 }
 0x578   : > { %v697_v31 = vsel %vm260_vm0, %v693_v30, -inf }
 0x579   : > { %698 = vmax.xlane.f32.xlu0 %v697_v31 }
 0x596   : > { %v2093_v17 = vpop.f32.mrf.mxu2 }
 0x597   : > { %v830_v34 = vand.u32 2147483647, %v2093_v17 }
 0x599   : > { %v832_v46 = vsel %vm260_vm0, %v830_v34, -inf }
 0x59a   : > { %833 = vmax.xlane.f32.xlu1 %v832_v46 }
 0x5d7   : > { %v2097_v22 = vpop.f32.mrf.mxu2 }
 0x5d8   : > { %v831_v47 = vand.u32 2147483647, %v2097_v22 }
 0x5da   : > { %v835_v48 = vsel %vm260_vm0, %v831_v47, -inf }
 0x5db   : > { %836 = vmax.xlane.f32.xlu2 %v835_v48 }
 0x5df   : > { %v2101_v50 = vpop.f32.mrf.mxu2 }
 0x5e0   : > { %v956_v51 = vand.u32 2147483647, %v2101_v50 }
 0x5e2   : > { %v958_v56 = vsel %vm260_vm0, %v956_v51, -inf }
 0x5e3   : > { %959 = vmax.xlane.f32.xlu0 %v958_v56 }
 0x5e4   : > { %v696_v57 = vpop.xlane.xlu2 %695 }
 0x5e5   : > { %v2105_v58 = vmax.f32 %v696_v57, 1e-05 }
 0x5e7   : > { %1583 = vrcp.f32 %v2105_v58  ;;  %v2108_v39 = vpop.f32.mrf.mxu2 }
 0x5e8   : > { %v957_v59 = vand.u32 2147483647, %v2108_v39 }
 0x5e9   : > { %v2111_v60 = vpop.f32.mrf.mxu1 }
 0x5ea   : > { %v1053_v61 = vand.u32 2147483647, %v2111_v60  ;;  %v961_v62 = vsel %vm260_vm0, %v957_v59, -inf }
 0x5eb   : > { %962 = vmax.xlane.f32.xlu2 %v961_v62 }
 0x5ec   : > { %v699_v63 = vpop.xlane.xlu0 %698  ;;  %v1054_v2 = vsel %vm260_vm0, %v1053_v61, -inf }
 0x5ed   : > { %v1584_v3 = vpop.eup %1583  ;;  %v2116_v8 = vmax.f32 %v699_v63, 1e-05  ;;  %1055 = vmax.xlane.f32.xlu1 %v1054_v2 }
 0x5ee   : > { %v704_v33 = vmul.f32 %v1584_v3, %v2105_v58 }
 0x5ef   : > { %1585 = vrcp.f32 %v2116_v8 }
 0x5f0   : > { %v706_v6 = vsub.f32 2.0, %v704_v33 }
 0x5f2   : > { %v708_v10 = vmul.f32 %v1584_v3, %v706_v6 }
 0x5f4   : > { %v710_v11 = vmul.f32 127.0, %v708_v10 }
 0x5f5   : > { %v1586_v12 = vpop.eup %1585 }
 0x5f6   : > { %v712_v13 = vmul.f32 %v710_v11, %v686_v52  ;;  %v705_v40 = vmul.f32 %v1586_v12, %v2116_v8 }
 0x5f8   : > { %v707_v4 = vsub.f32 2.0, %v705_v40  ;;  %v1390_v14 = vcvt.f32.s32 %v712_v13  ;;  %v1393_v7 = vand.u32 2147483648, %v712_v13  ;;  %v1388_v49 = vand.u32 2147483647, %v712_v13 }
 0x5fa   : > { %v709_v43 = vmul.f32 %v1586_v12, %v707_v4  ;;  %v1391_v15 = vcvt.s32.f32 %v1390_v14  ;;  %vm1389_vm8 = vcmp.lt.f32.partialorder %v1388_v49, 8388608.0 }
 0x5fc   : > { %v711_v35 = vmul.f32 127.0, %v709_v43  ;;  %v1392_v18 = vand.u32 2147483647, %v1391_v15 }
 0x5fe   : > { %v713_v19 = vmul.f32 %v711_v35, %v689_v38  ;;  %v1394_v28 = vor.u32 %v1393_v7, %v1392_v18 }
 0x600   : > { %v1398_v16 = vcvt.f32.s32 %v713_v19  ;;  %v1396_v23 = vand.u32 2147483647, %v713_v19  ;;  %v1395_v24 = vsel %vm1389_vm8, %v1394_v28, %v712_v13  ;;  %v1401_v0 = vand.u32 2147483648, %v713_v19 }
 0x601   : > { %v716_v25 = vmax.f32 %v1395_v24, -128.0 }
 0x602   : > { %v1399_v20 = vcvt.s32.f32 %v1398_v16  ;;  %vm1397_vm9 = vcmp.lt.f32.partialorder %v1396_v23, 8388608.0 }
 0x603   : > { %v718_v5 = vmin.f32 %v716_v25, 127.0 }
 0x604   : > { %v1400_v32 = vand.u32 2147483647, %v1399_v20 }
 0x606   : > { %v1402_v53 = vor.u32 %v1401_v0, %v1400_v32 }
 0x608   : > { %v1403_v26 = vsel %vm1397_vm9, %v1402_v53, %v713_v19 }
 0x609   : > { %v717_v1 = vmax.f32 %v1403_v26, -128.0 }
 0x60b   : > { %v719_v27 = vmin.f32 %v717_v1, 127.0 }
 0x60d   : > { %v722_v29 = vpack.c.bf16 %v719_v27, %v718_v5  ;;  %v834_v37 = vpop.xlane.xlu1 %833 }
 0x60e   : > { %v2122_v41 = vmax.f32 %v834_v37, 1e-05 }
 0x60f   : > { %1240 = vmatmul.msk.bf16.vlgmr.msra.gmra.mxu3 %vm260_vm0, %v722_v29 }
 0x610   : > { %1078 = vmatpush.bf16.msra.mxu3 %v1258_v36  ;;  %1587 = vrcp.f32 %v2122_v41 }
 0x614   : > { %1079 = vmatpush.bf16.msra.mxu3 %v1257_v55 }
 0x616   : > { %v1588_v54 = vpop.eup %1587 }
 0x617   : > { %v842_v9 = vmul.f32 %v1588_v54, %v2122_v41 }
 0x619   : > { %v844_v21 = vsub.f32 2.0, %v842_v9 }
 0x61b   : > { %v846_v42 = vmul.f32 %v1588_v54, %v844_v21 }
 0x61d   : > { %v848_v52 = vmul.f32 127.0, %v846_v42 }
 0x61f   : > { %v850_v38 = vmul.f32 %v848_v52, %v2093_v17 }
 0x621   : > { %v1406_v31 = vcvt.f32.s32 %v850_v38  ;;  %v1409_v2 = vand.u32 2147483648, %v850_v38  ;;  %v1404_v33 = vand.u32 2147483647, %v850_v38 }
 0x623   : > { %v1407_v36 = vcvt.s32.f32 %v1406_v31  ;;  %vm1405_vm10 = vcmp.lt.f32.partialorder %v1404_v33, 8388608.0 }
 0x625   : > { %v1408_v57 = vand.u32 2147483647, %v1407_v36 }
 0x627   : > { %v1410_v10 = vor.u32 %v1409_v2, %v1408_v57 }
 0x64e   : > { %v837_v44 = vpop.xlane.xlu2 %836 }
 0x64f   : > { %v2126_v45 = vmax.f32 %v837_v44, 1e-05 }
 0x651   : > { %1589 = vrcp.f32 %v2126_v45 }
 0x656   : > { %v960_v30 = vpop.xlane.xlu0 %959 }
 0x657   : > { %v1590_v34 = vpop.eup %1589  ;;  %v2130_v46 = vmax.f32 %v960_v30, 1e-05 }
 0x658   : > { %v843_v47 = vmul.f32 %v1590_v34, %v2126_v45 }
 0x659   : > { %1591 = vrcp.f32 %v2130_v46 }
 0x65a   : > { %v845_v48 = vsub.f32 2.0, %v843_v47 }
 0x65c   : > { %v847_v51 = vmul.f32 %v1590_v34, %v845_v48 }
 0x65e   : > { %v849_v55 = vmul.f32 127.0, %v847_v51  ;;  %v963_v56 = vpop.xlane.xlu2 %962 }
 0x65f   : > { %v1592_v59 = vpop.eup %1591  ;;  %v2134_v61 = vmax.f32 %v963_v56, 1e-05 }
 0x660   : > { %v851_v17 = vmul.f32 %v849_v55, %v2097_v22  ;;  %v968_v62 = vmul.f32 %v1592_v59, %v2130_v46  ;;  %v1056_v63 = vpop.xlane.xlu1 %1055  ;;  %v1411_v22 = vsel %vm1405_vm10, %v1410_v10, %v850_v38 }
 0x661   : > { %1593 = vrcp.f32 %v2134_v61  ;;  %v2139_v3 = vmax.f32 %v1056_v63, 1e-05  ;;  %v854_v49 = vmax.f32 %v1411_v22, -128.0  ;;  %v721_v22 = vmul.f32 0.007874016, %v2116_v8 }
 0x662   : > { %v970_v6 = vsub.f32 2.0, %v968_v62  ;;  %v1414_v11 = vcvt.f32.s32 %v851_v17  ;;  %v1412_v40 = vand.u32 2147483647, %v851_v17  ;;  %v1417_v43 = vand.u32 2147483648, %v851_v17 }
 0x663   : > { %1595 = vrcp.f32 %v2139_v3  ;;  %v856_v25 = vmin.f32 %v854_v49, 127.0  ;;  %v859_v49 = vmul.f32 0.007874016, %v2126_v45 }
 0x664   : > { %v972_v12 = vmul.f32 %v1592_v59, %v970_v6  ;;  %v1415_v13 = vcvt.s32.f32 %v1414_v11  ;;  %vm1413_vm11 = vcmp.lt.f32.partialorder %v1412_v40, 8388608.0  ;;  %v720_v11 = vmul.f32 0.007874016, %v2105_v58 }
 0x665   : > { %v879_v8 = vmul.f32 0.015900841, %v859_v49 }
 0x666   : > { %v974_v4 = vmul.f32 127.0, %v972_v12  ;;  %v1416_v14 = vand.u32 2147483647, %v1415_v13  ;;  %v752_v12 = vmul.f32 0.015900841, %v720_v11 }
 0x667   : > { %v1594_v15 = vpop.eup %1593 }
 0x668   : > { %v976_v35 = vmul.f32 %v974_v4, %v2101_v50  ;;  %v969_v18 = vmul.f32 %v1594_v15, %v2134_v61  ;;  %v1418_v19 = vor.u32 %v1417_v43, %v1416_v14  ;;  %v858_v14 = vmul.f32 0.007874016, %v2122_v41 }
 0x669   : > { %v1596_v7 = vpop.eup %1595  ;;  %v753_v43 = vmul.f32 0.015900841, %v721_v22 }
 0x66a   : > { %v1422_v28 = vcvt.f32.s32 %v976_v35  ;;  %v971_v16 = vsub.f32 2.0, %v969_v18  ;;  %v1059_v20 = vmul.f32 %v1596_v7, %v2139_v3  ;;  %v1419_v23 = vsel %vm1413_vm11, %v1418_v19, %v851_v17 }
 0x66b   : > { %v855_v24 = vmax.f32 %v1419_v23, -128.0  ;;  %v1425_v54 = vand.u32 2147483648, %v976_v35  ;;  %v1420_v9 = vand.u32 2147483647, %v976_v35 }
 0x66c   : > { %v973_v32 = vmul.f32 %v1594_v15, %v971_v16  ;;  %v1060_v0 = vsub.f32 2.0, %v1059_v20  ;;  %v1423_v53 = vcvt.s32.f32 %v1422_v28  ;;  %v878_v15 = vmul.f32 0.015900841, %v858_v14 }
 0x66d   : > { %v857_v26 = vmin.f32 %v855_v24, 127.0  ;;  %vm1421_vm12 = vcmp.lt.f32.partialorder %v1420_v9, 8388608.0  ;;  %v984_v28 = vmul.f32 0.007874016, %v2130_v46 }
 0x66e   : > { %v975_v1 = vmul.f32 127.0, %v973_v32  ;;  %v1061_v5 = vmul.f32 %v1596_v7, %v1060_v0  ;;  %v1424_v50 = vand.u32 2147483647, %v1423_v53  ;;  %v985_v0 = vmul.f32 0.007874016, %v2134_v61 }
 0x66f   : > { %v860_v27 = vpack.c.bf16 %v857_v26, %v856_v25  ;;  %v1004_v20 = vmul.f32 0.015900841, %v984_v28  ;;  %v1067_v53 = vmul.f32 0.007874016, %v2139_v3 }
 0x670   : > { %v977_v29 = vmul.f32 %v975_v1, %v2108_v39  ;;  %v1062_v37 = vmul.f32 127.0, %v1061_v5  ;;  %v1426_v52 = vor.u32 %v1425_v54, %v1424_v50  ;;  %v1005_v45 = vmul.f32 0.015900841, %v985_v0 }
 0x671   : > { %1243 = vmatmul.msk.bf16.vlgmr.msrb.gmra.mxu3 %vm260_vm0, %v860_v27  ;;  %v1085_v46 = vmul.f32 0.015900841, %v1067_v53 }
 0x672   : > { %v1430_v21 = vcvt.f32.s32 %v977_v29  ;;  %v1063_v42 = vmul.f32 %v1062_v37, %v2111_v60  ;;  %v1428_v30 = vand.u32 2147483647, %v977_v29  ;;  %v1427_v34 = vsel %vm1421_vm12, %v1426_v52, %v976_v35 }
 0x673   : > { %v1433_v48 = vand.u32 2147483648, %v977_v29  ;;  %v980_v56 = vmax.f32 %v1427_v34, -128.0 }
 0x674   : > { %v1438_v44 = vcvt.f32.s32 %v1063_v42  ;;  %v1431_v38 = vcvt.s32.f32 %v1430_v21  ;;  %v1436_v36 = vand.u32 2147483647, %v1063_v42  ;;  %v1441_v39 = vand.u32 2147483648, %v1063_v42 }
 0x675   : > { %vm1429_vm13 = vcmp.lt.f32.partialorder %v1428_v30, 8388608.0  ;;  %v982_v62 = vmin.f32 %v980_v56, 127.0 }
 0x676   : > { %v1439_v31 = vcvt.s32.f32 %v1438_v44  ;;  %v1432_v47 = vand.u32 2147483647, %v1431_v38  ;;  %vm1437_vm14 = vcmp.lt.f32.partialorder %v1436_v36, 8388608.0 }
 0x678   : > { %v1440_v51 = vand.u32 2147483647, %v1439_v31  ;;  %v1434_v55 = vor.u32 %v1433_v48, %v1432_v47 }
 0x67a   : > { %v1435_v57 = vsel %vm1429_vm13, %v1434_v55, %v977_v29  ;;  %v1442_v59 = vor.u32 %v1441_v39, %v1440_v51 }
 0x67b   : > { %v981_v17 = vmax.f32 %v1435_v57, -128.0 }
 0x67c   : > { %v1443_v60 = vsel %vm1437_vm14, %v1442_v59, %v1063_v42 }
 0x67d   : > { %v983_v63 = vmin.f32 %v981_v17, 127.0  ;;  %v1065_v2 = vmax.f32 %v1443_v60, -128.0 }
 0x67f   : > { %v986_v33 = vpack.c.bf16 %v983_v63, %v982_v62  ;;  %v1066_v6 = vmin.f32 %v1065_v2, 127.0 }
 0x681   : > { %1246 = vmatmul.msk.bf16.vlgmr.msrb.gmra.mxu0 %vm260_vm0, %v986_v33  ;;  %v1068_v10 = vpack.c.bf16 %v1066_v6, %v1066_v6 }
 0x683   : > { %1248 = vmatmul.msk.bf16.vlgmr.msra.gmra.mxu3 %vm260_vm0, %v1068_v10 }
 0x692   : > { %v747_v13 = vpop.f32.mrf.mxu3 }
 0x693   : > { %v754_v40 = vmul.f32 %v752_v12, %v747_v13 }
 0x695   : > { %1087 = vst.msk [vmem:[%s2153_s12] sm:$0xff] %vm260_vm0, %v754_v40 }
 0x69a   : > { %v749_v4 = vpop.f32.mrf.mxu3 }
 0x69b   : > { %v755_v18 = vmul.f32 %v753_v43, %v749_v4 }
 0x6f4   : > { %v873_v35 = vpop.f32.mrf.mxu3 }
 0x6f5   : > { %v880_v58 = vmul.f32 %v878_v15, %v873_v35 }
 0x6f7   : > { %v1088_v19 = vadd.f32 %v880_v58, %v755_v18 }
 0x6f9   : > { %v1089_v7 = vmul.f32 0.5, %v1088_v19 }
 0x6fb   : > { %1090 = vst.msk [vmem:[%s2153_s12 + $0x8] sm:$0xff] %vm260_vm0, %v1089_v7 }
 0x6fc   : > { %v875_v16 = vpop.f32.mrf.mxu3 }
 0x6fd   : > { %v881_v23 = vmul.f32 %v879_v8, %v875_v16 }
 0x6fe   : > { %v999_v41 = vpop.f32.mrf.mxu0 }
 0x6ff   : > { %v1006_v24 = vmul.f32 %v1004_v20, %v999_v41 }
 0x701   : > { %v1091_v32 = vadd.f32 %v1006_v24, %v881_v23 }
 0x703   : > { %v1092_v25 = vmul.f32 0.5, %v1091_v32 }
 0x705   : > { %1093 = vst.msk [vmem:[%s2153_s12 + $0x10] sm:$0xff] %vm260_vm0, %v1092_v25 }
 0x706   : > { %v1001_v26 = vpop.f32.mrf.mxu0  ;;  %v1081_v1 = vpop.f32.mrf.mxu3 }
 0x707   : > { %v1007_v5 = vmul.f32 %v1005_v45, %v1001_v26  ;;  %v1086_v61 = vmul.f32 %v1085_v46, %v1081_v1 }
 0x709   : > { %v1094_v3 = vadd.f32 %v1086_v61, %v1007_v5 }
 0x70b   : > { %v1095_v50 = vmul.f32 0.5, %v1094_v3 }
 0x70d   : > { %1096 = vst.msk [vmem:[%s2153_s12 + $0x18] sm:$0xff] %vm260_vm0, %v1095_v50 }
 0x70e   : > { %v1083_v27 = vpop.f32.mrf.mxu3 }
 0x70f   : > { %1714 = shalt.err (!%p1711_p10)
}
 0x710   : > { %s1770_s28 = smov 128   ;;  %s1771_s7 = smov 8  }
 0x711   : > { %1454 = dma.vmem_to_hbm [thread:$0]  (%p1863_p3), %s1111_s27, 512, %s1113_s29, %s1098_s19, %s1770_s28, %s1770_s28, %s1771_s7  }
 0x712 PF: > { %s1127_s11 = sand.u32 1, %s1745_s15   ;;  %p2215_p12 = scmp.ge.s32.totalorder %s1757_s18, 2 }
 0x713   : > { %s1128_s12 = scalar_lea.sflag [#allocation4], %s1127_s11 }
 0x714   : > { %p1468_p13 = pnand %p2215_p12, %p1832_p6 }
 0x716   : > { %p1469_p0 = pneg %p1468_p13 }
 0x718   : > { %1740 = dma.done.wait (%p1469_p0), %s1128_s12, 512  }
 0x719   : > { %1742 = vsyncadd (%p1469_p0), %s1128_s12, 4294966784  ;;  %p18_p5 = scmp.ge.s32.totalorder %s1853_s10, 4   ;;  %s2216_s15 = smov %s1749_s16 }
 0x71a   : > { %s2217_s16 = smov %s1753_s17  ;;  %s2218_s17 = smov %s1869_s14 }
 0x71b   : > { %s2219_s18 = smov %s1853_s10  ;;  %20 = sbr.rel (!%p18_p5) target bundleno = 6 (0x6), region = 89 }
 0x720   :  { %1134 = vsyncpa [#allocation3], 1 }
 0x721   :  { %1136 = vsyncpa [#allocation3 + $0x1], 1 }
 0x722   :  { %1137 = vsyncpa [#allocation6], 1 }
 0x723   :  { %1138 = vsyncpa [#allocation4], 1 }
 0x724   :  { %1140 = vsyncpa [#allocation4 + $0x1], 1 }

</bundles_post_ra>
